<compile_context>
chip_gen: v5e
topology: v5e:2x2
jax: 0.10.0
libtpu: 0.0.40
codegen_flags: <defaults>
</compile_context>

<pallas_src>
import functools

import jax
import jax.numpy as jnp
from jax import lax
from jax.experimental import pallas as pl
from jax.experimental.pallas import tpu as pltpu

BITS = 8                # BIT_TYPE_DICT['int8'].bits
EXACT_DIVIDES = False   # True: keep torch's true divides (bit-parity at floor boundaries).
                        # False: reciprocal multiplies (faster on the VALU-bound int path).


# ----------------------------------------------------------------------------
# Exact power-of-two helpers (IEEE-754 exponent-field manipulation; VPU only).
# Shared by the kernel and the pure-JAX reference so both use identical formulas.
# ----------------------------------------------------------------------------
def _exp2_from_field(field_i32):
    """bitcast(field << 23) == 2.0**(field - 127); exact; 0.0 when field == 0."""
    return lax.bitcast_convert_type(jnp.left_shift(field_i32, 23), jnp.float32)


def _exp2_int(k_i32):
    """Exact 2.0**k for integer k in [-126, 127]."""
    return _exp2_from_field(k_i32 + 127)


def _float_exp_field(x_f32):
    """Biased IEEE-754 exponent field of non-negative finite x (== floor(log2 x) + 127)."""
    bits = lax.bitcast_convert_type(x_f32, jnp.int32)
    return jnp.right_shift(bits, 23) & 0xFF


def _int_scalar_constants(scale):
    """Scale-only constants of the I-BERT int softmax (hoisted out of the kernel)."""
    scale = jnp.asarray(scale, dtype=jnp.float32).reshape(())
    x0_int = jnp.floor(jnp.float32(-0.6931) / scale)
    b_int = jnp.floor(jnp.float32(0.96963238 / 0.35815147) / scale)
    c_int = jnp.floor(jnp.float32(1.0 / 0.35815147) / (scale * scale))
    inv_scale = 1.0 / scale          # hoisted reciprocals (see EXACT_DIVIDES)
    inv_x0 = 1.0 / x0_int
    return (scale, x0_int, b_int, c_int, inv_scale, inv_x0)


# ----------------------------------------------------------------------------
# Shared math (used by the Pallas kernel and by the pure-JAX reference)
# ----------------------------------------------------------------------------
def _int_log_softmax_math(x, consts, *, bits, exact_divides):
    """int_softmax -> round(sum/exp) -> log_round (mantissa>=1.5) -> clamp -> 2**-q."""
    scale, x0_int, b_int, c_int, inv_scale, inv_x0 = consts
    x = x.astype(jnp.float32)

    # ---- int_softmax (I-BERT polynomial exp) --------------------------------
    x_int = (x / scale) if exact_divides else (x * inv_scale)
    x_int = x_int - jnp.max(x_int, axis=-1, keepdims=True)
    x_int = jnp.maximum(x_int, 30.0 * x0_int)                       # n = 30
    q = jnp.floor(x_int / x0_int) if exact_divides else jnp.floor(x_int * inv_x0)
    r = x_int - x0_int * q
    z = r * (r + b_int) + c_int                                     # int_polynomial
    pow2 = _exp2_int((30.0 - q).astype(jnp.int32))                  # exact 2**(30-q), no EUP
    exp_int = jnp.maximum(jnp.floor(z * pow2), 0.0)
    exp_int_sum = jnp.sum(exp_int, axis=-1, keepdims=True)

    # ---- round(sum/exp), log_round, clamp, dequant --------------------------
    # torch: sum / 0 -> inf -> rounds = inf -> masked to 0; guard the divisor so the
    # exponent-field path never sees inf/nan.
    zero = exp_int == 0.0
    softmax_out = jnp.round(exp_int_sum / jnp.where(zero, 1.0, exp_int))   # >= 1, finite

    field = _float_exp_field(softmax_out)
    big = field - 127                                               # floor(log2(softmax_out))
    # Spec's log_round: +1 when x - 2**big >= 2**(big-1), i.e. mantissa >= 1.5.
    extra = (softmax_out - _exp2_from_field(field)) >= _exp2_from_field(field - 1)
    rounds = big + extra.astype(jnp.int32)

    mask = (rounds >= (1 << bits)) | zero
    qlog = jnp.clip(rounds, 0, (1 << bits) - 1)
    # NOTE: for rounds in (127, 2**bits-1] torch yields a subnormal 2**-rounds while this
    # flushes to 0.0; unreachable for realistic scales (rounds <= ~50).
    deq = _exp2_from_field(jnp.maximum(127 - qlog, 0))              # exact 2**-qlog
    return jnp.where(mask, 0.0, deq)


# ----------------------------------------------------------------------------
# Kernels
# ----------------------------------------------------------------------------
def _int_log_softmax_kernel(sc_ref, x_ref, o_ref, *, bits, exact_divides):
    consts = tuple(sc_ref[i] for i in range(6))                     # SMEM scalar constants
    o_ref[...] = _int_log_softmax_math(
        x_ref[...], consts, bits=bits, exact_divides=exact_divides).astype(o_ref.dtype)


def _softmax_kernel(x_ref, o_ref):
    """Plain softmax over the last axis (quant=False / calibrate=False path)."""
    x = x_ref[...].astype(jnp.float32)
    x = x - jnp.max(x, axis=-1, keepdims=True)
    e = jnp.exp(x)
    inv = 1.0 / jnp.sum(e, axis=-1, keepdims=True)                  # one divide per row
    o_ref[...] = (e * inv).astype(o_ref.dtype)


# ----------------------------------------------------------------------------
# Tiling / VMEM budgets
# ----------------------------------------------------------------------------
def _round_up(a, m):
    return (a + m - 1) // m * m


@functools.lru_cache(maxsize=None)
def _budgets():
    """(vmem_limit_bytes, softmax_block_bytes, int_block_bytes), derived from the chip.

    Budgets are in f32 *working* bytes (kernels upcast to f32), so bf16 inputs don't
    over-commit VMEM.  The int path gets a smaller budget because several full-block f32
    temporaries (exp_int etc.) stay live across the row sum.
    """
    try:
        vmem_cap = pltpu.get_tpu_info().vmem_capacity_bytes
    except Exception:
        vmem_cap = 64 * 1024 * 1024          # conservative default (v7x per-TC VMEM)
    vmem_limit = min(3 * vmem_cap // 4, 96 * 1024 * 1024)
    if vmem_cap >= 100 * 1024 * 1024:        # v5e / v6e: 128 MiB VMEM
        return vmem_limit, 8 << 20, 4 << 20
    return vmem_limit, 4 << 20, 2 << 20      # v7x (64 MiB/TC) or unknown


def _choose_row_tile(rows, cols, layout_itemsize, block_bytes):
    """Largest sublane-aligned row tile whose f32 working block fits `block_bytes`.

    Bigger tiles amortize the ~0.35 us per-grid-step overhead on these HBM-bound paths;
    rows are independent, so the boundary block is simply masked by Pallas (no host pad).
    """
    mult = 16 if layout_itemsize == 2 else 8          # sublane packing multiple
    per_row = max(cols * 4, 1)                        # f32 working bytes per row
    tr = max(mult, (block_bytes // per_row) // mult * mult)
    return min(tr, _round_up(rows, mult))


def _flatten_rows(x):
    cols = x.shape[-1]
    rows = 1
    for d in x.shape[:-1]:
        rows *= d
    return x.reshape(rows, cols), rows, cols


# ----------------------------------------------------------------------------
# Wrappers
# ----------------------------------------------------------------------------
def _int_log_softmax(x, scale, bits=BITS, exact_divides=EXACT_DIVIDES):
    orig_shape = x.shape
    x2, rows, cols = _flatten_rows(x)
    vmem_limit, _, int_blk = _budgets()
    tr = _choose_row_tile(rows, cols, x.dtype.itemsize, int_blk)

    consts = jnp.stack(list(_int_scalar_constants(scale))).astype(jnp.float32)

    out = pl.pallas_call(
        functools.partial(_int_log_softmax_kernel, bits=bits, exact_divides=exact_divides),
        out_shape=jax.ShapeDtypeStruct((rows, cols), x.dtype),
        grid=(pl.cdiv(rows, tr),),                     # boundary block masked; no host pad/slice
        in_specs=[
            pl.BlockSpec(memory_space=pltpu.MemorySpace.SMEM),     # scalar constants
            pl.BlockSpec((tr, cols), lambda i: (i, 0)),
        ],
        out_specs=pl.BlockSpec((tr, cols), lambda i: (i, 0)),
        compiler_params=pltpu.CompilerParams(
            dimension_semantics=("parallel",),
            vmem_limit_bytes=vmem_limit),
    )(consts, x2)
    return out.reshape(orig_shape)


def _plain_softmax(x):
    orig_shape = x.shape
    x2, rows, cols = _flatten_rows(x)
    vmem_limit, sm_blk, _ = _budgets()
    tr = _choose_row_tile(rows, cols, x.dtype.itemsize, sm_blk)

    out = pl.pallas_call(
        _softmax_kernel,
        out_shape=jax.ShapeDtypeStruct((rows, cols), x.dtype),
        grid=(pl.cdiv(rows, tr),),                     # boundary block masked; no host pad/slice
        in_specs=[pl.BlockSpec((tr, cols), lambda i: (i, 0))],
        out_specs=pl.BlockSpec((tr, cols), lambda i: (i, 0)),
        compiler_params=pltpu.CompilerParams(
            dimension_semantics=("parallel",),
            vmem_limit_bytes=vmem_limit),
    )(x2)
    return out.reshape(orig_shape)


class QIntSoftmax:
    """JAX/Pallas port of the PyTorch QIntSoftmax forward pass."""

    def __init__(self, log_i_softmax=False, quant=False, calibrate=False,
                 last_calibrate=False, bits=BITS, calibration_mode='layer_wise'):
        self.log_i_softmax = log_i_softmax
        self.quant = quant
        self.calibrate = calibrate
        self.last_calibrate = last_calibrate
        self.bits = bits
        self.calibration_mode = calibration_mode
        # TODO(synk): observer / quantizer (minmax + uniform) state not ported.

    def __call__(self, x, scale):
        if self.log_i_softmax and scale is not None:
            # layer_wise calibration: scale is a scalar.
            return _int_log_softmax(x, scale, self.bits)
        else:
            out = _plain_softmax(x)
            # quant=False (default) -> return the softmax output directly.
            return out


# ----------------------------------------------------------------------------
# Pure-JAX reference (sanity check; shares the exact same math helpers)
# ----------------------------------------------------------------------------
def _ref_int_log_softmax(x, scale, bits=BITS, exact_divides=EXACT_DIVIDES):
    consts = _int_scalar_constants(scale)
    return _int_log_softmax_math(
        x, consts, bits=bits, exact_divides=exact_divides).astype(x.dtype)


if __name__ == "__main__":
    key = jax.random.PRNGKey(0)
    scale = 0.05  # layer-wise activation scaling factor

    def _check(shape):
        x = jax.random.normal(key, shape, dtype=jnp.float32) * 2.0

        # Path 1: log_i_softmax integer softmax.
        mod_int = QIntSoftmax(log_i_softmax=True)
        out_int = jax.block_until_ready(mod_int(x, scale))
        ref_int = _ref_int_log_softmax(x, scale)
        assert out_int.shape == x.shape and out_int.dtype == x.dtype
        mism = out_int != ref_int
        frac = float(jnp.mean(mism.astype(jnp.float32)))
        # The output is log2-quantized; ULP-level differences in the division / row-sum
        # order between the Pallas kernel and XLA can flip round(sum/exp) at half-integer
        # boundaries, moving a value by exactly one log2 bucket.  Tolerate a tiny fraction
        # of such single-bucket flips; anything else is a real bug.
        assert frac < 0.05, f"int path mismatch fraction {frac}"
        if frac > 0.0:
            both_nz = (out_int > 0) & (ref_int > 0)
            assert bool(jnp.all(~mism | both_nz)), "int path zero-pattern mismatch"
            hi = jnp.where(both_nz, jnp.maximum(out_int, ref_int), 1.0)
            lo = jnp.where(both_nz, jnp.minimum(out_int, ref_int), 1.0)
            assert float(jnp.max(hi / lo)) <= 2.0, \
                "int path mismatch exceeds one log2 bucket"

        # Path 2: plain softmax (module defaults quant=False / calibrate=False).
        mod_fp = QIntSoftmax(log_i_softmax=False)
        out_fp = jax.block_until_ready(mod_fp(x, None))
        ref_fp = jax.nn.softmax(x, axis=-1)
        assert out_fp.shape == x.shape and out_fp.dtype == x.dtype
        assert jnp.allclose(out_fp, ref_fp, rtol=1e-3, atol=1e-6), "softmax mismatch"

    _check((2, 4, 16, 128))   # lane-dense Sk (typical attention sequence length)
    _check((2, 4, 16, 16))    # small, non-128-multiple Sk (general / lane-masked path)

    print("KERNEL_OK")
</pallas_src>

<mosaic_0001>
module attributes {stable_mosaic.version = 11 : i64} {
  func.func @_int_log_softmax_kernel(%arg0: i32, %arg1: memref<6xf32, #tpu.memory_space<smem>>, %arg2: memref<128x128xf32, #tpu.memory_space<vmem>>, %arg3: memref<128x128xf32, #tpu.memory_space<vmem>>) attributes {dimension_semantics = [#tpu.dimension_semantics<parallel>], iteration_bounds = array<i64: 1>, scalar_prefetch = 0 : i64, scratch_operands = 0 : i64, tpu.core_type = #tpu.core_type<tc>, window_params = [{transform_indices = @transform_0, window_bounds = array<i64: 6>}, {transform_indices = @transform_1, window_bounds = array<i64: 128, 128>}, {transform_indices = @transform_2, window_bounds = array<i64: 128, 128>}]} {
    %c1 = arith.constant 1 : index
    %0 = memref.load %arg1[%c1] : memref<6xf32, #tpu.memory_space<smem>>
    %c2 = arith.constant 2 : index
    %1 = memref.load %arg1[%c2] : memref<6xf32, #tpu.memory_space<smem>>
    %c3 = arith.constant 3 : index
    %2 = memref.load %arg1[%c3] : memref<6xf32, #tpu.memory_space<smem>>
    %c4 = arith.constant 4 : index
    %3 = memref.load %arg1[%c4] : memref<6xf32, #tpu.memory_space<smem>>
    %c5 = arith.constant 5 : index
    %4 = memref.load %arg1[%c5] : memref<6xf32, #tpu.memory_space<smem>>
    %c0 = arith.constant 0 : index
    %c0_0 = arith.constant 0 : index
    %5 = vector.load %arg2[%c0, %c0_0] : memref<128x128xf32, #tpu.memory_space<vmem>>, vector<128x128xf32>
    %6 = vector.broadcast %3 : f32 to vector<128x128xf32>
    %7 = arith.mulf %5, %6 : vector<128x128xf32>
    %cst = arith.constant dense<0xFF800000> : vector<128xf32>
    %8 = vector.multi_reduction <maximumf>, %7, %cst [1] : vector<128x128xf32> to vector<128xf32>
    %9 = vector.shape_cast %8 : vector<128xf32> to vector<128x1xf32>
    %10 = vector.broadcast %9 : vector<128x1xf32> to vector<128x128xf32>
    %11 = arith.subf %7, %10 : vector<128x128xf32>
    %cst_1 = arith.constant 3.000000e+01 : f32
    %12 = arith.mulf %cst_1, %0 : f32
    %13 = vector.broadcast %12 : f32 to vector<128x128xf32>
    %14 = arith.maximumf %11, %13 : vector<128x128xf32>
    %15 = vector.broadcast %4 : f32 to vector<128x128xf32>
    %16 = arith.mulf %14, %15 : vector<128x128xf32>
    %17 = math.floor %16 : vector<128x128xf32>
    %18 = vector.broadcast %0 : f32 to vector<128x128xf32>
    %19 = arith.mulf %18, %17 : vector<128x128xf32>
    %20 = arith.subf %14, %19 : vector<128x128xf32>
    %21 = vector.broadcast %1 : f32 to vector<128x128xf32>
    %22 = arith.addf %20, %21 : vector<128x128xf32>
    %23 = arith.mulf %20, %22 : vector<128x128xf32>
    %24 = vector.broadcast %2 : f32 to vector<128x128xf32>
    %25 = arith.addf %23, %24 : vector<128x128xf32>
    %cst_2 = arith.constant 3.000000e+01 : f32
    %26 = vector.broadcast %cst_2 : f32 to vector<128x128xf32>
    %27 = arith.subf %26, %17 : vector<128x128xf32>
    %28 = arith.fptosi %27 : vector<128x128xf32> to vector<128x128xi32>
    %c127_i32 = arith.constant 127 : i32
    %29 = vector.broadcast %c127_i32 : i32 to vector<128x128xi32>
    %30 = arith.addi %28, %29 : vector<128x128xi32>
    %c23_i32 = arith.constant 23 : i32
    %31 = vector.broadcast %c23_i32 : i32 to vector<128x128xi32>
    %32 = arith.shli %30, %31 : vector<128x128xi32>
    %33 = tpu.bitcast %32 : vector<128x128xi32> -> vector<128x128xf32>
    %34 = arith.mulf %25, %33 : vector<128x128xf32>
    %35 = math.floor %34 : vector<128x128xf32>
    %cst_3 = arith.constant 0.000000e+00 : f32
    %36 = vector.broadcast %cst_3 : f32 to vector<128x128xf32>
    %37 = arith.maximumf %35, %36 : vector<128x128xf32>
    %cst_4 = arith.constant dense<0.000000e+00> : vector<128xf32>
    %38 = vector.multi_reduction <add>, %37, %cst_4 [1] : vector<128x128xf32> to vector<128xf32>
    %39 = vector.shape_cast %38 : vector<128xf32> to vector<128x1xf32>
    %cst_5 = arith.constant 0.000000e+00 : f32
    %40 = vector.broadcast %cst_5 : f32 to vector<128x128xf32>
    %41 = arith.cmpf oeq, %37, %40 : vector<128x128xf32>
    %cst_6 = arith.constant 1.000000e+00 : f32
    %42 = vector.broadcast %cst_6 : f32 to vector<128x128xf32>
    %43 = arith.select %41, %42, %37 : vector<128x128xi1>, vector<128x128xf32>
    %44 = vector.broadcast %39 : vector<128x1xf32> to vector<128x128xf32>
    %45 = arith.divf %44, %43 : vector<128x128xf32>
    %46 = math.roundeven %45 : vector<128x128xf32>
    %47 = tpu.bitcast %46 : vector<128x128xf32> -> vector<128x128xi32>
    %c23_i32_7 = arith.constant 23 : i32
    %48 = vector.broadcast %c23_i32_7 : i32 to vector<128x128xi32>
    %49 = arith.shrsi %47, %48 : vector<128x128xi32>
    %c255_i32 = arith.constant 255 : i32
    %50 = vector.broadcast %c255_i32 : i32 to vector<128x128xi32>
    %51 = arith.andi %49, %50 : vector<128x128xi32>
    %c127_i32_8 = arith.constant 127 : i32
    %52 = vector.broadcast %c127_i32_8 : i32 to vector<128x128xi32>
    %53 = arith.subi %51, %52 : vector<128x128xi32>
    %c23_i32_9 = arith.constant 23 : i32
    %54 = vector.broadcast %c23_i32_9 : i32 to vector<128x128xi32>
    %55 = arith.shli %51, %54 : vector<128x128xi32>
    %56 = tpu.bitcast %55 : vector<128x128xi32> -> vector<128x128xf32>
    %57 = arith.subf %46, %56 : vector<128x128xf32>
    %c1_i32 = arith.constant 1 : i32
    %58 = vector.broadcast %c1_i32 : i32 to vector<128x128xi32>
    %59 = arith.subi %51, %58 : vector<128x128xi32>
    %c23_i32_10 = arith.constant 23 : i32
    %60 = vector.broadcast %c23_i32_10 : i32 to vector<128x128xi32>
    %61 = arith.shli %59, %60 : vector<128x128xi32>
    %62 = tpu.bitcast %61 : vector<128x128xi32> -> vector<128x128xf32>
    %63 = arith.cmpf oge, %57, %62 : vector<128x128xf32>
    %64 = arith.extui %63 : vector<128x128xi1> to vector<128x128xi32>
    %65 = arith.addi %53, %64 : vector<128x128xi32>
    %c256_i32 = arith.constant 256 : i32
    %66 = vector.broadcast %c256_i32 : i32 to vector<128x128xi32>
    %67 = arith.cmpi sge, %65, %66 : vector<128x128xi32>
    %68 = arith.ori %67, %41 : vector<128x128xi1>
    %c0_i32 = arith.constant 0 : i32
    %c255_i32_11 = arith.constant 255 : i32
    %69 = vector.broadcast %c0_i32 : i32 to vector<128x128xi32>
    %70 = arith.maxsi %69, %65 : vector<128x128xi32>
    %71 = vector.broadcast %c255_i32_11 : i32 to vector<128x128xi32>
    %72 = arith.minsi %71, %70 : vector<128x128xi32>
    %c127_i32_12 = arith.constant 127 : i32
    %73 = vector.broadcast %c127_i32_12 : i32 to vector<128x128xi32>
    %74 = arith.subi %73, %72 : vector<128x128xi32>
    %c0_i32_13 = arith.constant 0 : i32
    %75 = vector.broadcast %c0_i32_13 : i32 to vector<128x128xi32>
    %76 = arith.maxsi %74, %75 : vector<128x128xi32>
    %c23_i32_14 = arith.constant 23 : i32
    %77 = vector.broadcast %c23_i32_14 : i32 to vector<128x128xi32>
    %78 = arith.shli %76, %77 : vector<128x128xi32>
    %79 = tpu.bitcast %78 : vector<128x128xi32> -> vector<128x128xf32>
    %cst_15 = arith.constant 0.000000e+00 : f32
    %80 = vector.broadcast %cst_15 : f32 to vector<128x128xf32>
    %81 = arith.select %68, %80, %79 : vector<128x128xi1>, vector<128x128xf32>
    %c0_16 = arith.constant 0 : index
    %c0_17 = arith.constant 0 : index
    %82 = vector.load %arg3[%c0_16, %c0_17] : memref<128x128xf32, #tpu.memory_space<vmem>>, vector<128x128xf32>
    tpu.vector_store %arg3[%c0_16, %c0_17], %81 {strides = array<i32>} : memref<128x128xf32, #tpu.memory_space<vmem>>, vector<128x128xf32>,
    return
  }
  func.func @transform_0(%arg0: i32) -> i32 {
    %c0_i32 = arith.constant 0 : i32
    %c0_i32_0 = arith.constant 0 : i32
    return %c0_i32 : i32
  }
  func.func @transform_1(%arg0: i32) -> (i32, i32) {
    %c0_i32 = arith.constant 0 : i32
    %c0_i32_0 = arith.constant 0 : i32
    return %arg0, %c0_i32 : i32, i32
  }
  func.func @transform_2(%arg0: i32) -> (i32, i32) {
    %c0_i32 = arith.constant 0 : i32
    %c0_i32_0 = arith.constant 0 : i32
    return %arg0, %c0_i32 : i32, i32
  }
}

</mosaic_0001>

<bundles_post_ra>
// kernel: tpu_custom_call.1
= control target key start
LH: loop header
LB: loop body
LE: loop exit
PB: predicated region body
PF: predicated region fallthrough
CT: control target
= control target key end

     0   :  { %7 = vsyncpa [#allocation5], 0  ;;  %s2588_s0 = inlined_call_operand.hbm [shape: f32[6], index: 0, kind: input, shape index: {}]   ;;  %s2589_s1 = inlined_call_operand.hbm [shape: f32[128,128], index: 1, kind: input, shape index: {}]   ;;  %s2590_s2 = inlined_call_operand.hbm [shape: f32[128,128], index: 2, kind: output, shape index: {}]  }
   0x1   :  { %8 = vsyncpa [#allocation3], 0 }
   0x2   :  { %9 = vsyncpa [#allocation4], 0  ;;  %s15_s11 = sshll.u32 %s2588_s0, 4  ;;  %s23_s14 = sshll.u32 %s2589_s1, 4  ;;  %s16_s11 = int_to_ptr.hbm [resolvable:$true] %s15_s11  ;;  %s24_s14 = int_to_ptr.hbm [resolvable:$true] %s23_s14 }
   0x3   :  { %s1494_s15 = smov [#allocation2]   ;;  %s1495_s16 = smov [#allocation6]  }
   0x4   :  { %18 = dma.hbm_to_smem %s16_s11, 16, %s1494_s15, [#allocation5]  }
   0x5   :  { %s25_s17 = sshll.u32 %s1495_s16, 4  ;;  %s1496_s18 = smov 128   ;;  %s26_s17 = int_to_ptr.vmem [resolvable:$true] %s25_s17 }
   0x6   :  { %s1497_s19 = smov 8  }
   0x7   :  { %31 = dma.hbm_to_vmem [thread:$0]  %s24_s14, 2048, %s26_s17, [#allocation3], %s1496_s18, %s1496_s18, %s1497_s19  }
   0x8   :  { %1488 = dma.done.wait [#allocation5], 16  }
   0x9   :  { %1489 = vsyncadd [#allocation5], 4294967280 }
   0xa   :  { %1490 = dma.done.wait [#allocation3], 2048  }
   0xb   :  { %1491 = vsyncadd [#allocation3], 4294965248 }
   0xc   :  { %40 = sfence }
   0xd   :  { %s1148_s0 = sld [smem:[#allocation2 + $0x4]]  ;;  %v50_v0 = vld [vmem:[#allocation6 + $0x20] sm:$0xff]  ;;  %v48_v1 = vld [vmem:[#allocation6 + $0x10] sm:$0xff]  ;;  %v51_v7 = vld [vmem:[#allocation6 + $0x28] sm:$0xff]  ;;  %s1499_s24 = smov [#allocation7]  }
   0xe   :  { %v46_v2 = vld [vmem:[#allocation6] sm:$0xff]  ;;  %v49_v8 = vld [vmem:[#allocation6 + $0x18] sm:$0xff]  ;;  %v47_v9 = vld [vmem:[#allocation6 + $0x8] sm:$0xff]  ;;  %s1145_s1 = sld [smem:[#allocation2 + $0x1]]  ;;  %s1129_s25 = sshll.u32 %s1499_s24, 4  ;;  %s1130_s25 = int_to_ptr.vmem [resolvable:$true] %s1129_s25 }
   0xf   :  { %v54_v13 = vld [vmem:[#allocation6 + $0x40] sm:$0xff]  ;;  %v53_v14 = vld [vmem:[#allocation6 + $0x38] sm:$0xff]  ;;  %v52_v15 = vld [vmem:[#allocation6 + $0x30] sm:$0xff]  ;;  %s1149_s20 = sld [smem:[#allocation2 + $0x5]]  ;;  %s1131_s28 = sshll.u32 %s2590_s2, 4  ;;  %s1132_s28 = int_to_ptr.hbm [resolvable:$true] %s1131_s28 }
  0x10   :  { %v57_v19 = vld [vmem:[#allocation6 + $0x58] sm:$0xff]  ;;  %v56_v20 = vld [vmem:[#allocation6 + $0x50] sm:$0xff]  ;;  %v55_v21 = vld [vmem:[#allocation6 + $0x48] sm:$0xff]  ;;  %s1146_s22 = sld [smem:[#allocation2 + $0x2]] }
  0x11   :  { %v60_v25 = vld [vmem:[#allocation6 + $0x70] sm:$0xff]  ;;  %v59_v26 = vld [vmem:[#allocation6 + $0x68] sm:$0xff]  ;;  %v58_v27 = vld [vmem:[#allocation6 + $0x60] sm:$0xff]  ;;  %s1147_s23 = sld [smem:[#allocation2 + $0x3]] }
  0x12   :  { %v61_v31 = vld [vmem:[#allocation6 + $0x78] sm:$0xff] }
  0x13   :  { %v62_v3 = vstv %s1148_s0 }
  0x14   :  { %v67_v4 = vmul.f32 %v62_v3, %v50_v0  ;;  %v65_v5 = vmul.f32 %v62_v3, %v48_v1  ;;  %v63_v6 = vmul.f32 %v62_v3, %v46_v2  ;;  %v1524_v10 = vmul.f32 %v62_v3, %v51_v7  ;;  %s127_s21 = smul.f32 30.0, %s1145_s1 }
  0x15   :  { %v1526_v11 = vmul.f32 %v62_v3, %v49_v8  ;;  %v1528_v12 = vmul.f32 %v62_v3, %v47_v9  ;;  %v1533_v16 = vmul.f32 %v62_v3, %v54_v13  ;;  %v1535_v17 = vmul.f32 %v62_v3, %v53_v14 }
  0x16   :  { %87 = vmax.xlane.f32.xlu2 %v67_v4  ;;  %83 = vmax.xlane.f32.xlu1 %v65_v5  ;;  %v1537_v18 = vmul.f32 %v62_v3, %v52_v15  ;;  %v1542_v22 = vmul.f32 %v62_v3, %v57_v19  ;;  %v1544_v23 = vmul.f32 %v62_v3, %v56_v20  ;;  %v1563_v34 = vstv %s127_s21 }
  0x17   :  { %79 = vmax.xlane.f32.xlu0 %v63_v6  ;;  %v1546_v24 = vmul.f32 %v62_v3, %v55_v21  ;;  %v1551_v28 = vmul.f32 %v62_v3, %v60_v25  ;;  %v1553_v29 = vmul.f32 %v62_v3, %v59_v26  ;;  %v1555_v30 = vmul.f32 %v62_v3, %v58_v27 }
  0x18   :  { %v1560_v32 = vmul.f32 %v62_v3, %v61_v31  ;;  %v1565_v39 = vstv %s1149_s20  ;;  %v1572_v50 = vstv %s1145_s1  ;;  %v1585_v7 = vstv %s1146_s22 }
  0x19   :  { %v1597_v31 = vstv %s1147_s23 }
  0x1e   :  { %89 = vmax.xlane.f32.xlu2 %v1524_v10  ;;  %85 = vmax.xlane.f32.xlu1 %v1526_v11 }
  0x1f   :  { %81 = vmax.xlane.f32.xlu0 %v1528_v12 }
  0x26   :  { %95 = vmax.xlane.f32.xlu2 %v1533_v16  ;;  %93 = vmax.xlane.f32.xlu1 %v1535_v17 }
  0x27   :  { %91 = vmax.xlane.f32.xlu0 %v1537_v18 }
  0x2e   :  { %101 = vmax.xlane.f32.xlu2 %v1542_v22  ;;  %99 = vmax.xlane.f32.xlu1 %v1544_v23 }
  0x2f   :  { %97 = vmax.xlane.f32.xlu0 %v1546_v24 }
  0x36   :  { %107 = vmax.xlane.f32.xlu2 %v1551_v28  ;;  %105 = vmax.xlane.f32.xlu1 %v1553_v29 }
  0x37   :  { %103 = vmax.xlane.f32.xlu0 %v1555_v30 }
  0x3f   :  { %109 = vmax.xlane.f32.xlu0 %v1560_v32 }
  0x89   :  { %v88_v33 = vpop.xlane.xlu2 %87  ;;  %v84_v35 = vpop.xlane.xlu1 %83 }
  0x8a   :  { %v115_v36 = vsub.f32 %v67_v4, %v88_v33  ;;  %v113_v37 = vsub.f32 %v65_v5, %v84_v35  ;;  %v80_v38 = vpop.xlane.xlu0 %79 }
  0x8b   :  { %v111_v40 = vsub.f32 %v63_v6, %v80_v38 }
  0x8c   :  { %v131_v41 = vmax.f32 %v113_v37, %v1563_v34  ;;  %v133_v42 = vmax.f32 %v115_v36, %v1563_v34 }
  0x8d   :  { %v129_v44 = vmax.f32 %v111_v40, %v1563_v34 }
  0x8e   :  { %v148_v43 = vmul.f32 %v1565_v39, %v131_v41  ;;  %v150_v48 = vmul.f32 %v1565_v39, %v133_v42 }
  0x8f   :  { %v146_v52 = vmul.f32 %v1565_v39, %v129_v44 }
  0x90   :  { %v164_v45 = vfloor.f32 %v148_v43  ;;  %v166_v55 = vfloor.f32 %v150_v48 }
  0x91   :  { %v90_v46 = vpop.xlane.xlu2 %89  ;;  %v86_v47 = vpop.xlane.xlu1 %85  ;;  %v162_v60 = vfloor.f32 %v146_v52 }
  0x92   :  { %v82_v49 = vpop.xlane.xlu0 %81  ;;  %v263_v51 = vsub.f32 30.0, %v164_v45  ;;  %v116_v53 = vsub.f32 %v1524_v10, %v90_v46  ;;  %v114_v54 = vsub.f32 %v1526_v11, %v86_v47  ;;  %v181_v56 = vmul.f32 %v1572_v50, %v164_v45 }
  0x93   :  { %v112_v61 = vsub.f32 %v1528_v12, %v82_v49  ;;  %v183_v6 = vmul.f32 %v1572_v50, %v166_v55  ;;  %v179_v8 = vmul.f32 %v1572_v50, %v162_v60  ;;  %v1589_v11 = vsub.f32 30.0, %v166_v55 }
  0x94   :  { %v134_v57 = vmax.f32 %v116_v53, %v1563_v34  ;;  %v1193_v58 = vceil.f32 %v263_v51  ;;  %v1194_v59 = vfloor.f32 %v263_v51  ;;  %vm1192_vm0 = vcmp.lt.s32.totalorder %v263_v51, 0 }
  0x95   :  { %v132_v63 = vmax.f32 %v114_v54, %v1563_v34  ;;  %v197_v2 = vsub.f32 %v131_v41, %v181_v56  ;;  %v130_v3 = vmax.f32 %v112_v61, %v1563_v34  ;;  %v199_v20 = vsub.f32 %v133_v42, %v183_v6 }
  0x96   :  { %v151_v62 = vmul.f32 %v1565_v39, %v134_v57  ;;  %v1195_v9 = vsel %vm1192_vm0, %v1193_v58, %v1194_v59  ;;  %v195_v21 = vsub.f32 %v129_v44, %v179_v8  ;;  %v261_v25 = vsub.f32 30.0, %v162_v60 }
  0x97   :  { %v149_v13 = vmul.f32 %v1565_v39, %v132_v63  ;;  %v214_v15 = vadd.f32 %v1585_v7, %v197_v2  ;;  %v1196_v19 = vcvt.f32.s32 %v1195_v9  ;;  %v1203_v33 = vceil.f32 %v1589_v11 }
  0x98   :  { %v167_v12 = vfloor.f32 %v151_v62  ;;  %v1204_v40 = vfloor.f32 %v1589_v11  ;;  %v212_v44 = vadd.f32 %v1585_v7, %v195_v21  ;;  %v1183_v45 = vceil.f32 %v261_v25 }
  0x99   :  { %v96_v0 = vpop.xlane.xlu2 %95  ;;  %v94_v1 = vpop.xlane.xlu1 %93  ;;  %v165_v36 = vfloor.f32 %v149_v13  ;;  %v230_v41 = vmul.f32 %v214_v15, %v197_v2  ;;  %v295_v43 = vadd.s32 127, %v1196_v19  ;;  %v1184_v53 = vfloor.f32 %v261_v25 }
  0x9a   :  { %v119_v4 = vsub.f32 %v1533_v16, %v96_v0  ;;  %v92_v5 = vpop.xlane.xlu0 %91  ;;  %v118_v14 = vsub.f32 %v1535_v17, %v94_v1  ;;  %v147_v16 = vmul.f32 %v1565_v39, %v130_v3  ;;  %v184_v35 = vmul.f32 %v1572_v50, %v167_v12 }
  0x9b   :  { %v117_v26 = vsub.f32 %v1537_v18, %v92_v5  ;;  %v216_v18 = vadd.f32 %v1585_v7, %v199_v20  ;;  %v1610_v47 = vsub.f32 30.0, %v167_v12  ;;  %v182_v55 = vmul.f32 %v1572_v50, %v165_v36 }
  0x9c   :  { %v137_v10 = vmax.f32 %v119_v4, %v1563_v34  ;;  %v1602_v17 = vmax.f32 %v118_v14, %v1563_v34  ;;  %v163_v42 = vfloor.f32 %v147_v16  ;;  %v200_v54 = vsub.f32 %v134_v57, %v184_v35 }
  0x9d   :  { %v1608_v46 = vmax.f32 %v117_v26, %v1563_v34  ;;  %v1617_v58 = vsub.f32 30.0, %v165_v36  ;;  %v247_v60 = vadd.f32 %v1597_v31, %v230_v41  ;;  %v311_v61 = vshll.u32 %v295_v43, 23 }
  0x9e   :  { %v154_v27 = vmul.f32 %v1565_v39, %v137_v10  ;;  %v153_v56 = vmul.f32 %v1565_v39, %v1602_v17  ;;  %v180_v59 = vmul.f32 %v1572_v50, %v163_v42  ;;  %v1621_v62 = vmul.f32 %v216_v18, %v199_v20 }
  0x9f   :  { %v228_v0 = vmul.f32 %v212_v44, %v195_v21  ;;  %v1208_v1 = vceil.f32 %v1610_v47  ;;  %v217_v5 = vadd.f32 %v1585_v7, %v200_v54  ;;  %v1209_v6 = vfloor.f32 %v1610_v47 }
  0xa0   :  { %v170_v48 = vfloor.f32 %v154_v27  ;;  %v198_v8 = vsub.f32 %v132_v63, %v182_v55  ;;  %v169_v9 = vfloor.f32 %v153_v56  ;;  %v1198_v12 = vceil.f32 %v1617_v58 }
  0xa1   :  { %v102_v37 = vpop.xlane.xlu2 %101  ;;  %v100_v38 = vpop.xlane.xlu1 %99  ;;  %v196_v13 = vsub.f32 %v130_v3, %v180_v59  ;;  %v1637_v14 = vsub.f32 30.0, %v163_v42  ;;  %vm1182_vm1 = vcmp.lt.s32.totalorder %v261_v25, 0  ;;  %v1199_v20 = vfloor.f32 %v1617_v58 }
  0xa2   :  { %v122_v49 = vsub.f32 %v1542_v22, %v102_v37  ;;  %v121_v51 = vsub.f32 %v1544_v23, %v100_v38  ;;  %v98_v52 = vpop.xlane.xlu0 %97  ;;  %v152_v22 = vmul.f32 %v1565_v39, %v1608_v46  ;;  %v187_v2 = vmul.f32 %v1572_v50, %v170_v48 }
  0xa3   :  { %v120_v57 = vsub.f32 %v1546_v24, %v98_v52  ;;  %v343_v24 = vmul.f32 %v311_v61, %v247_v60  ;;  %v233_v27 = vmul.f32 %v217_v5, %v200_v54  ;;  %v215_v3 = vadd.f32 %v1585_v7, %v198_v8 }
  0xa4   :  { %v1626_v23 = vmax.f32 %v122_v49, %v1563_v34  ;;  %v1632_v4 = vmax.f32 %v121_v51, %v1563_v34  ;;  %v168_v15 = vfloor.f32 %v152_v22  ;;  %v203_v21 = vsub.f32 %v137_v10, %v187_v2 }
  0xa5   :  { %v1642_v19 = vmax.f32 %v120_v57, %v1563_v34  ;;  %v359_v26 = vfloor.f32 %v343_v24  ;;  %v186_v35 = vmul.f32 %v1572_v50, %v169_v9  ;;  %v1185_v36 = vsel %vm1182_vm1, %v1183_v45, %v1184_v53 }
  0xa6   :  { %v157_v16 = vmul.f32 %v1565_v39, %v1626_v23  ;;  %v156_v63 = vmul.f32 %v1565_v39, %v1632_v4  ;;  %v213_v37 = vadd.f32 %v1585_v7, %v196_v13  ;;  %v1188_v38 = vceil.f32 %v1637_v14 }
  0xa7   :  { %v1651_v41 = vsub.f32 30.0, %v170_v48  ;;  %v1653_v25 = vmax.f32 %v359_v26, 0.0  ;;  %v185_v10 = vmul.f32 %v1572_v50, %v168_v15  ;;  %v155_v18 = vmul.f32 %v1565_v39, %v1642_v19 }
  0xa8   :  { %v173_v43 = vfloor.f32 %v157_v16  ;;  %v1186_v44 = vcvt.f32.s32 %v1185_v36  ;;  %v1189_v49 = vfloor.f32 %v1637_v14  ;;  %v220_v45 = vadd.f32 %v1585_v7, %v203_v21 }
  0xa9   :  { %v108_v42 = vpop.xlane.xlu2 %107  ;;  %v1660_v51 = vsub.f32 30.0, %v169_v9  ;;  %v172_v52 = vfloor.f32 %v156_v63  ;;  %393 = vadd.xlane.f32.xlu0 %v1653_v25  ;;  %v1663_v48 = vmul.f32 %v215_v3, %v198_v8  ;;  %v202_v53 = vsub.f32 %v1602_v17, %v186_v35  ;;  %v106_v36 = vpop.xlane.xlu1 %105 }
  0xaa   :  { %v293_v54 = vadd.s32 127, %v1186_v44  ;;  %v125_v55 = vsub.f32 %v1551_v28, %v108_v42  ;;  %v229_v56 = vmul.f32 %v213_v37, %v196_v13  ;;  %v1223_v59 = vceil.f32 %v1651_v41  ;;  %v104_v13 = vpop.xlane.xlu0 %103 }
  0xab   :  { %v1668_v60 = vsub.f32 30.0, %v168_v15  ;;  %v245_v61 = vadd.f32 %v1597_v31, %v228_v0  ;;  %v1224_v22 = vfloor.f32 %v1651_v41  ;;  %v201_v57 = vsub.f32 %v1608_v46, %v185_v10 }
  0xac   :  { %v190_v2 = vmul.f32 %v1572_v50, %v173_v43  ;;  %v171_v5 = vfloor.f32 %v155_v18  ;;  %v1674_v8 = vmul.f32 %v220_v45, %v203_v21  ;;  %v1218_v17 = vceil.f32 %v1660_v51 }
  0xad   :  { %v189_v28 = vmul.f32 %v1572_v50, %v172_v52  ;;  %v309_v9 = vshll.u32 %v293_v54, 23  ;;  %v219_v24 = vadd.f32 %v1585_v7, %v202_v53  ;;  %v1219_v15 = vfloor.f32 %v1660_v51 }
  0xae   :  { %v1681_v0 = vmax.f32 %v125_v55, %v1563_v34  ;;  %vm1207_vm2 = vcmp.lt.s32.totalorder %v1610_v47, 0  ;;  %v1213_v46 = vceil.f32 %v1668_v60  ;;  %v1214_v16 = vfloor.f32 %v1668_v60 }
  0xaf   :  { %v341_v21 = vmul.f32 %v309_v9, %v245_v61  ;;  %v1210_v63 = vsel %vm1207_vm2, %v1208_v1, %v1209_v6  ;;  %v218_v26 = vadd.f32 %v1585_v7, %v201_v57  ;;  %v206_v3 = vsub.f32 %v1626_v23, %v190_v2 }
  0xb0   :  { %v188_v35 = vmul.f32 %v1572_v50, %v171_v5  ;;  %v1211_v37 = vcvt.f32.s32 %v1210_v63  ;;  %v1689_v42 = vsub.f32 30.0, %v173_v43  ;;  %v205_v10 = vsub.f32 %v1632_v4, %v189_v28 }
  0xb1   :  { %v357_v18 = vfloor.f32 %v341_v21  ;;  %vm1187_vm3 = vcmp.lt.s32.totalorder %v1637_v14, 0  ;;  %v1693_v47 = vsub.f32 30.0, %v172_v52  ;;  %v160_v1 = vmul.f32 %v1565_v39, %v1681_v0 }
  0xb2   :  { %v298_v6 = vadd.s32 127, %v1211_v37  ;;  %v1190_v44 = vsel %vm1187_vm3, %v1188_v38, %v1189_v49  ;;  %v1697_v45 = vmul.f32 %v219_v24, %v202_v53  ;;  %v124_v54 = vsub.f32 %v1553_v29, %v106_v36  ;;  %v110_v9 = vpop.xlane.xlu0 %109 }
  0xb3   :  { %v1699_v23 = vmax.f32 %v357_v18, 0.0  ;;  %v250_v43 = vadd.f32 %v1597_v31, %v233_v27  ;;  %v223_v4 = vadd.f32 %v1585_v7, %v206_v3  ;;  %v204_v55 = vsub.f32 %v1642_v19, %v188_v35 }
  0xb4   :  { %v1705_v14 = vsub.f32 30.0, %v171_v5  ;;  %v314_v52 = vshll.u32 %v298_v6, 23  ;;  %v1707_v61 = vmul.f32 %v218_v26, %v201_v57  ;;  %v1238_v2 = vceil.f32 %v1689_v42 }
  0xb5   :  { %v222_v38 = vadd.f32 %v1585_v7, %v205_v10  ;;  %389 = vadd.xlane.f32.xlu1 %v1699_v23  ;;  %v1191_v49 = vcvt.f32.s32 %v1190_v44  ;;  %v1239_v29 = vfloor.f32 %v1689_v42  ;;  %v1233_v27 = vceil.f32 %v1693_v47 }
  0xb6   :  { %v176_v53 = vfloor.f32 %v160_v1  ;;  %v123_v28 = vsub.f32 %v1555_v30, %v104_v13  ;;  %v1234_v19 = vfloor.f32 %v1693_v47  ;;  %v1717_v5 = vmax.f32 %v124_v54, %v1563_v34 }
  0xb7   :  { %v346_v57 = vmul.f32 %v314_v52, %v250_v43  ;;  %vm1197_vm4 = vcmp.lt.s32.totalorder %v1617_v58, 0  ;;  %v1720_v24 = vmul.f32 %v223_v4, %v206_v3  ;;  %v221_v21 = vadd.f32 %v1585_v7, %v204_v55 }
  0xb8   :  { %v1228_v63 = vceil.f32 %v1705_v14  ;;  %v1229_v26 = vfloor.f32 %v1705_v14  ;;  %v1725_v35 = vmul.f32 %v222_v38, %v205_v10  ;;  %v246_v13 = vadd.f32 %v1597_v31, %v229_v56 }
  0xb9   :  { %v362_v30 = vfloor.f32 %v346_v57  ;;  %v294_v36 = vadd.s32 127, %v1191_v49  ;;  %v193_v37 = vmul.f32 %v1572_v50, %v176_v53  ;;  %v1730_v18 = vmax.f32 %v123_v28, %v1563_v34 }
  0xba   :  { %v1200_v3 = vsel %vm1197_vm4, %v1198_v12, %v1199_v20  ;;  %v126_v1 = vsub.f32 %v1560_v32, %v110_v9  ;;  %v159_v10 = vmul.f32 %v1565_v39, %v1717_v5  ;;  %v1741_v54 = vmul.f32 %v221_v21, %v204_v55 }
  0xbb   :  { %v1739_v6 = vmax.f32 %v362_v30, 0.0  ;;  %v310_v44 = vshll.u32 %v294_v36, 23  ;;  %v1201_v56 = vcvt.f32.s32 %v1200_v3  ;;  %v1743_v43 = vsub.f32 30.0, %v176_v53 }
  0xbc   :  { %v144_v4 = vmax.f32 %v126_v1, %v1563_v34  ;;  %vm1222_vm5 = vcmp.lt.s32.totalorder %v1651_v41, 0  ;;  %v248_v32 = vadd.f32 %v1597_v31, %v1663_v48  ;;  %v209_v55 = vsub.f32 %v1681_v0, %v193_v37 }
  0xbd   :  { %399 = vadd.xlane.f32.xlu0 %v1739_v6  ;;  %v342_v58 = vmul.f32 %v310_v44, %v246_v13  ;;  %v296_v12 = vadd.s32 127, %v1201_v56  ;;  %v1225_v20 = vsel %vm1222_vm5, %v1223_v59, %v1224_v22  ;;  %v158_v52 = vmul.f32 %v1565_v39, %v1730_v18 }
  0xbe   :  { %v1758_v34 = vmul.f32 %v1565_v39, %v144_v4  ;;  %v1226_v38 = vcvt.f32.s32 %v1225_v20  ;;  %v175_v49 = vfloor.f32 %v159_v10  ;;  %vm1202_vm6 = vcmp.lt.s32.totalorder %v1589_v11, 0 }
  0xbf   :  { %v358_v53 = vfloor.f32 %v342_v58  ;;  %v312_v28 = vshll.u32 %v296_v12, 23  ;;  %v253_v41 = vadd.f32 %v1597_v31, %v1674_v8  ;;  %v1205_v22 = vsel %vm1202_vm6, %v1203_v33, %v1204_v40 }
  0xc0   :  { %v177_v48 = vfloor.f32 %v1758_v34  ;;  %v301_v59 = vadd.s32 127, %v1226_v38  ;;  %v1206_v57 = vcvt.f32.s32 %v1205_v22  ;;  %vm1212_vm7 = vcmp.lt.s32.totalorder %v1668_v60, 0 }
  0xc1   :  { %v1768_v0 = vmax.f32 %v358_v53, 0.0  ;;  %v344_v39 = vmul.f32 %v312_v28, %v248_v32  ;;  %v174_v9 = vfloor.f32 %v158_v52  ;;  %v1215_v8 = vsel %vm1212_vm7, %v1213_v46, %v1214_v16 }
  0xc2   :  { %v194_v21 = vmul.f32 %v1572_v50, %v177_v48  ;;  %v317_v30 = vshll.u32 %v301_v59, 23  ;;  %v249_v33 = vadd.f32 %v1597_v31, %v1621_v62  ;;  %v297_v40 = vadd.s32 127, %v1206_v57 }
  0xc3   :  { %391 = vadd.xlane.f32.xlu2 %v1768_v0  ;;  %v360_v11 = vfloor.f32 %v344_v39  ;;  %v1216_v13 = vcvt.f32.s32 %v1215_v8  ;;  %v226_v36 = vadd.f32 %v1585_v7, %v209_v55  ;;  %v1253_v37 = vceil.f32 %v1743_v43 }
  0xc4   :  { %v1254_v3 = vfloor.f32 %v1743_v43  ;;  %v210_v1 = vsub.f32 %v144_v4, %v194_v21  ;;  %v192_v10 = vmul.f32 %v1572_v50, %v175_v49  ;;  %v349_v60 = vmul.f32 %v317_v30, %v253_v41 }
  0xc5   :  { %v1785_v44 = vmax.f32 %v360_v11, 0.0  ;;  %v313_v46 = vshll.u32 %v297_v40, 23  ;;  %v251_v62 = vadd.f32 %v1597_v31, %v1707_v61  ;;  %v299_v56 = vadd.s32 127, %v1216_v13 }
  0xc6   :  { %v227_v16 = vadd.f32 %v1585_v7, %v210_v1  ;;  %vm1237_vm8 = vcmp.lt.s32.totalorder %v1689_v42, 0  ;;  %v191_v58 = vmul.f32 %v1572_v50, %v174_v9  ;;  %v365_v32 = vfloor.f32 %v349_v60 }
  0xc7   :  { %395 = vadd.xlane.f32.xlu1 %v1785_v44  ;;  %v345_v4 = vmul.f32 %v313_v46, %v249_v33  ;;  %v1240_v12 = vsel %vm1237_vm8, %v1238_v2, %v1239_v29  ;;  %v1797_v20 = vsub.f32 30.0, %v175_v49  ;;  %v315_v38 = vshll.u32 %v299_v56, 23 }
  0xc8   :  { %v1799_v52 = vmul.f32 %v227_v16, %v210_v1  ;;  %v1241_v61 = vcvt.f32.s32 %v1240_v12  ;;  %v242_v53 = vmul.f32 %v226_v36, %v209_v55  ;;  %v273_v28 = vsub.f32 30.0, %v174_v9 }
  0xc9   :  { %v1801_v41 = vmax.f32 %v365_v32, 0.0  ;;  %v361_v50 = vfloor.f32 %v345_v4  ;;  %v347_v59 = vmul.f32 %v315_v38, %v251_v62  ;;  %v256_v22 = vadd.f32 %v1597_v31, %v1720_v24 }
  0xca   :  { %v304_v39 = vadd.s32 127, %v1241_v61  ;;  %vm1217_vm9 = vcmp.lt.s32.totalorder %v1660_v51, 0  ;;  %v207_v42 = vsub.f32 %v1730_v18, %v191_v58  ;;  %vm1227_vm10 = vcmp.lt.s32.totalorder %v1705_v14, 0 }
  0xcb   :  { %405 = vadd.xlane.f32.xlu0 %v1801_v41  ;;  %v1808_v2 = vmax.f32 %v361_v50, 0.0  ;;  %v1220_v29 = vsel %vm1217_vm9, %v1218_v17, %v1219_v15  ;;  %v208_v55 = vsub.f32 %v1717_v5, %v192_v10  ;;  %v363_v49 = vfloor.f32 %v347_v59 }
  0xcc   :  { %v320_v24 = vshll.u32 %v304_v39, 23  ;;  %v1221_v57 = vcvt.f32.s32 %v1220_v29  ;;  %v1248_v9 = vceil.f32 %v1797_v20  ;;  %v1249_v18 = vfloor.f32 %v1797_v20 }
  0xcd   :  { %v1243_v21 = vceil.f32 %v273_v28  ;;  %397 = vadd.xlane.f32.xlu2 %v1808_v2  ;;  %v1230_v51 = vsel %vm1227_vm10, %v1228_v63, %v1229_v26  ;;  %v1823_v17 = vmax.f32 %v363_v49, 0.0  ;;  %v252_v5 = vadd.f32 %v1597_v31, %v1697_v45 }
  0xce   :  { %v352_v15 = vmul.f32 %v320_v24, %v256_v22  ;;  %v300_v30 = vadd.s32 127, %v1221_v57  ;;  %v224_v8 = vadd.f32 %v1585_v7, %v207_v42  ;;  %v1244_v11 = vfloor.f32 %v273_v28 }
  0xcf   :  { %v1231_v33 = vcvt.f32.s32 %v1230_v51  ;;  %vm1252_vm11 = vcmp.lt.s32.totalorder %v1743_v43, 0  ;;  %v276_v40 = vsub.f32 30.0, %v177_v48  ;;  %401 = vadd.xlane.f32.xlu1 %v1823_v17  ;;  %v254_v13 = vadd.f32 %v1597_v31, %v1741_v54 }
  0xd0   :  { %v368_v14 = vfloor.f32 %v352_v15  ;;  %v316_v63 = vshll.u32 %v300_v30, 23  ;;  %v1255_v26 = vsel %vm1252_vm11, %v1253_v37, %v1254_v3  ;;  %vm1232_vm12 = vcmp.lt.s32.totalorder %v1693_v47, 0 }
  0xd1   :  { %v302_v36 = vadd.s32 127, %v1231_v33  ;;  %v1256_v45 = vcvt.f32.s32 %v1255_v26  ;;  %v225_v1 = vadd.f32 %v1585_v7, %v208_v55  ;;  %v1235_v34 = vsel %vm1232_vm12, %v1233_v27, %v1234_v19 }
  0xd2   :  { %v1836_v10 = vmax.f32 %v368_v14, 0.0  ;;  %v348_v43 = vmul.f32 %v316_v63, %v252_v5  ;;  %v259_v37 = vadd.f32 %v1597_v31, %v242_v53  ;;  %v1236_v60 = vcvt.f32.s32 %v1235_v34 }
  0xd3   :  { %v318_v48 = vshll.u32 %v302_v36, 23  ;;  %v307_v3 = vadd.s32 127, %v1256_v45  ;;  %v240_v54 = vmul.f32 %v224_v8, %v207_v42  ;;  %v1258_v46 = vceil.f32 %v276_v40 }
  0xd4   :  { %411 = vadd.xlane.f32.xlu0 %v1836_v10  ;;  %v364_v16 = vfloor.f32 %v348_v43  ;;  %vm1242_vm13 = vcmp.lt.s32.totalorder %v273_v28, 0  ;;  %v255_v56 = vadd.f32 %v1597_v31, %v1725_v35  ;;  %v303_v58 = vadd.s32 127, %v1236_v60 }
  0xd5   :  { %v350_v7 = vmul.f32 %v318_v48, %v254_v13  ;;  %v323_v62 = vshll.u32 %v307_v3, 23  ;;  %v1259_v32 = vfloor.f32 %v276_v40  ;;  %v1245_v27 = vsel %vm1242_vm13, %v1243_v21, %v1244_v11 }
  0xd6   :  { %v1846_v47 = vmax.f32 %v364_v16, 0.0  ;;  %vm1247_vm14 = vcmp.lt.s32.totalorder %v1797_v20, 0  ;;  %v319_v12 = vshll.u32 %v303_v58, 23  ;;  %v1246_v38 = vcvt.f32.s32 %v1245_v27 }
  0xd7   :  { %v366_v19 = vfloor.f32 %v350_v7  ;;  %v355_v4 = vmul.f32 %v323_v62, %v259_v37  ;;  %v241_v61 = vmul.f32 %v225_v1, %v208_v55  ;;  %v1250_v53 = vsel %vm1247_vm14, %v1248_v9, %v1249_v18 }
  0xd8   :  { %403 = vadd.xlane.f32.xlu2 %v1846_v47  ;;  %vm1257_vm15 = vcmp.lt.s32.totalorder %v276_v40, 0  ;;  %v351_v35 = vmul.f32 %v319_v12, %v255_v56  ;;  %v257_v59 = vadd.f32 %v1597_v31, %v240_v54  ;;  %v305_v22 = vadd.s32 127, %v1246_v38 }
  0xd9   :  { %v1850_v28 = vmax.f32 %v366_v19, 0.0  ;;  %v371_v50 = vfloor.f32 %v355_v4  ;;  %v1251_v39 = vcvt.f32.s32 %v1250_v53  ;;  %v1260_v42 = vsel %vm1257_vm15, %v1258_v46, %v1259_v32 }
  0xda   :  { %v367_v29 = vfloor.f32 %v351_v35  ;;  %v1261_v49 = vcvt.f32.s32 %v1260_v42  ;;  %v321_v55 = vshll.u32 %v305_v22, 23  ;;  %v258_v24 = vadd.f32 %v1597_v31, %v241_v61 }
  0xdb   :  { %407 = vadd.xlane.f32.xlu1 %v1850_v28  ;;  %v1854_v20 = vmax.f32 %v371_v50, 0.0  ;;  %v306_v57 = vadd.s32 127, %v1251_v39  ;;  %v260_v9 = vadd.f32 %v1597_v31, %v1799_v52  ;;  %vm423_vm0 = vcmp.eq.f32.partialorder %v1653_v25, 0.0 }
  0xdc   :  { %v308_v18 = vadd.s32 127, %v1261_v49  ;;  %v1860_v21 = vmax.f32 %v367_v29, 0.0  ;;  %v353_v51 = vmul.f32 %v321_v55, %v257_v59  ;;  %v1875_v52 = vsel %vm423_vm0, 1.0, %v1653_v25 }
  0xdd   :  { %417 = vadd.xlane.f32.xlu0 %v1854_v20  ;;  %v322_v15 = vshll.u32 %v306_v57, 23  ;;  %vm421_vm1 = vcmp.eq.f32.partialorder %v1699_v23, 0.0  ;;  %1396 = vrcp.f32 %v1875_v52  ;;  %vm426_vm2 = vcmp.eq.f32.partialorder %v1739_v6, 0.0 }
  0xde   :  { %v324_v5 = vshll.u32 %v308_v18, 23  ;;  %v369_v30 = vfloor.f32 %v353_v51  ;;  %v1883_v26 = vsel %vm421_vm1, 1.0, %v1699_v23  ;;  %vm422_vm3 = vcmp.eq.f32.partialorder %v1768_v0, 0.0 }
  0xdf   :  { %v354_v8 = vmul.f32 %v322_v15, %v258_v24  ;;  %1398 = vrcp.f32 %v1883_v26  ;;  %vm424_vm4 = vcmp.eq.f32.partialorder %v1785_v44, 0.0  ;;  %v1894_v36 = vsel %vm426_vm2, 1.0, %v1739_v6 }
  0xe0   :  { %409 = vadd.xlane.f32.xlu2 %v1860_v21  ;;  %v356_v11 = vmul.f32 %v324_v5, %v260_v9  ;;  %v1863_v33 = vmax.f32 %v369_v30, 0.0  ;;  %v1899_v45 = vsel %vm422_vm3, 1.0, %v1768_v0  ;;  %vm429_vm5 = vcmp.eq.f32.partialorder %v1801_v41, 0.0 }
  0xe1   :  { %v370_v40 = vfloor.f32 %v354_v8  ;;  %v1905_v1 = vsel %vm424_vm4, 1.0, %v1785_v44  ;;  %vm2601_vm6 = vcmp.eq.f32.partialorder %v1808_v2, 0.0  ;;  %1400 = vrcp.f32 %v1894_v36 }
  0xe2   :  { %v372_v14 = vfloor.f32 %v356_v11  ;;  %vm2600_vm7 = vcmp.eq.f32.partialorder %v1823_v17, 0.0  ;;  %1402 = vrcp.f32 %v1899_v45  ;;  %v1918_v48 = vsel %vm429_vm5, 1.0, %v1801_v41 }
  0xe3   :  { %413 = vadd.xlane.f32.xlu1 %v1863_v33  ;;  %v1866_v63 = vmax.f32 %v370_v40, 0.0  ;;  %v1888_v13 = vpop.eup %1396  ;;  %vm2598_vm8 = vcmp.eq.f32.partialorder %v1836_v10, 0.0  ;;  %1404 = vrcp.f32 %v1905_v1  ;;  %v1925_v37 = vsel %vm2601_vm6, 1.0, %v1808_v2 }
  0xe4   :  { %v1870_v31 = vmax.f32 %v372_v14, 0.0  ;;  %v484_v43 = vmul.f32 %v1888_v13, %v1875_v52  ;;  %vm2594_vm9 = vcmp.eq.f32.partialorder %v1846_v47, 0.0  ;;  %v1931_v3 = vsel %vm2600_vm7, 1.0, %v1823_v17 }
  0xe5   :  { %v1910_v34 = vpop.eup %1398  ;;  %vm2593_vm10 = vcmp.eq.f32.partialorder %v1850_v28, 0.0  ;;  %1406 = vrcp.f32 %v1918_v48  ;;  %v1940_v46 = vsel %vm2598_vm8, 1.0, %v1836_v10  ;;  %v1946_v16 = vsel %vm2594_vm9, 1.0, %v1846_v47 }
  0xe6   :  { %2602 = vst [vmem:[#allocation11_spill] sm:$0xff] %v1870_v31  ;;  %v485_v60 = vsub.f32 1.0, %v484_v43  ;;  %v454_v54 = vmul.f32 %v1910_v34, %v1883_v26  ;;  %1408 = vrcp.f32 %v1925_v37  ;;  %v1954_v62 = vsel %vm2593_vm10, 1.0, %v1850_v28 }
  0xe7   :  { %v1948_v7 = vpop.eup %1400  ;;  %1410 = vrcp.f32 %v1931_v3  ;;  %vm2592_vm11 = vcmp.eq.f32.partialorder %v1854_v20, 0.0  ;;  %vm2591_vm12 = vcmp.eq.f32.partialorder %v1860_v21, 0.0  ;;  %vm2595_vm13 = vcmp.eq.f32.partialorder %v1863_v33, 0.0 }
  0xe8   :  { %415 = vadd.xlane.f32.xlu2 %v1866_v63  ;;  %v1957_v56 = vpop.eup %1402  ;;  %1412 = vrcp.f32 %v1940_v46  ;;  %v486_v58 = vmul.f32 %v1888_v13, %v485_v60  ;;  %v455_v32 = vsub.f32 1.0, %v454_v54  ;;  %v1969_v19 = vsel %vm2592_vm11, 1.0, %v1854_v20 }
  0xe9   :  { %v1962_v27 = vpop.eup %1404  ;;  %1414 = vrcp.f32 %v1946_v16  ;;  %v529_v4 = vmul.f32 %v1948_v7, %v1894_v36  ;;  %v1978_v38 = vsel %vm2591_vm12, 1.0, %v1860_v21  ;;  %vm489_vm14 = vweird.f32 %v1888_v13 }
  0xea   :  { %1416 = vrcp.f32 %v1954_v62  ;;  %v492_v61 = vand.u32 2147483647, %v1875_v52  ;;  %vm2597_vm15 = vcmp.eq.f32.partialorder %v1866_v63, 0.0  ;;  %v487_v50 = vadd.f32 %v1888_v13, %v486_v58 }
  0xeb   :  { %419 = vadd.xlane.f32.xlu1 %v1870_v31  ;;  %v1973_v12 = vpop.eup %1406  ;;  %v456_v35 = vmul.f32 %v1910_v34, %v455_v32  ;;  %v469_v59 = vmul.f32 %v1957_v56, %v1899_v45  ;;  %1418 = vrcp.f32 %v1969_v19  ;;  %vm2596_vm12 = vcmp.eq.f32.partialorder %v1870_v31, 0.0 }
  0xec   :  { %v1983_v53 = vpop.eup %1408  ;;  %vm488_vm11 = vweird.f32 %v1875_v52  ;;  %v494_v39 = vand.u32 2147483648, %v1875_v52  ;;  %1420 = vrcp.f32 %v1978_v38  ;;  %v2002_v29 = vsel %vm2595_vm13, 1.0, %v1863_v33 }
  0xed   :  { %v1990_v22 = vpop.eup %1410  ;;  %v530_v49 = vsub.f32 1.0, %v529_v4  ;;  %v499_v55 = vmul.f32 %v1962_v27, %v1905_v1  ;;  %v2011_v57 = vsel %vm2597_vm15, 1.0, %v1866_v63  ;;  %vm2015_vm10 = vmor %vm488_vm11, %vm489_vm14  ;;  %vm2019_vm9 = vcmp.eq.f32.partialorder %v492_v61, 8.507059e+37 }
  0xee   :  { %v1996_v42 = vpop.eup %1412  ;;  %vm459_vm13 = vweird.f32 %v1910_v34  ;;  %v462_v51 = vand.u32 2147483647, %v1883_v26  ;;  %v2030_v5 = vsel %vm2596_vm12, 1.0, %v1870_v31  ;;  %v491_v30 = vsel %vm2015_vm10, %v1888_v13, %v487_v50 }
  0xef   :  { %v2006_v24 = vpop.eup %1414  ;;  %v457_v8 = vadd.f32 %v1910_v34, %v456_v35  ;;  %v470_v11 = vsub.f32 1.0, %v469_v59  ;;  %1422 = vrcp.f32 %v2002_v29  ;;  %v495_v40 = vor.u32 1.1754944e-38, %v494_v39 }
  0xf0   :  { %v2025_v15 = vpop.eup %1416  ;;  %vm458_vm11 = vweird.f32 %v1883_v26  ;;  %v464_v14 = vand.u32 2147483648, %v1883_v26  ;;  %1424 = vrcp.f32 %v2011_v57  ;;  %v531_v52 = vmul.f32 %v1948_v7, %v530_v49 }
  0xf1   :  { %v500_v43 = vsub.f32 1.0, %v499_v55  ;;  %v574_v60 = vmul.f32 %v1973_v12, %v1918_v48  ;;  %v2043_v54 = vpop.eup %1418  ;;  %1426 = vrcp.f32 %v2030_v5  ;;  %v2048_v13 = vsel %vm2019_vm9, %v495_v40, %v491_v30  ;;  %vm2052_vm10 = vmor %vm458_vm11, %vm459_vm13 }
  0xf2   :  { %vm463_vm14 = vcmp.eq.f32.partialorder %v462_v51, 8.507059e+37  ;;  %v2056_v58 = vpop.eup %1420  ;;  %v461_v32 = vsel %vm2052_vm10, %v1910_v34, %v457_v8  ;;  %vm533_vm12 = vweird.f32 %v1894_v36  ;;  %v471_v4 = vmul.f32 %v1957_v56, %v470_v11 }
  0xf3   :  { %v514_v61 = vmul.f32 %v1983_v53, %v1925_v37  ;;  %v465_v50 = vor.u32 1.1754944e-38, %v464_v14  ;;  %vm534_vm9 = vweird.f32 %v1948_v7  ;;  %v537_v35 = vand.u32 2147483647, %v1894_v36 }
  0xf4   :  { %v539_v59 = vand.u32 2147483648, %v1894_v36  ;;  %v532_v39 = vadd.f32 %v1948_v7, %v531_v52  ;;  %vm473_vm13 = vweird.f32 %v1899_v45  ;;  %v501_v34 = vmul.f32 %v1962_v27, %v500_v43  ;;  %vm2090_vm10 = vmor %vm533_vm12, %vm534_vm9 }
  0xf5   :  { %v575_v49 = vsub.f32 1.0, %v574_v60  ;;  %v2071_v55 = vpop.eup %1422  ;;  %v2073_v9 = vsel %vm463_vm14, %v465_v50, %v461_v32  ;;  %v477_v18 = vand.u32 2147483647, %v1899_v45  ;;  %v479_v51 = vand.u32 2147483648, %v1899_v45 }
  0xf6   :  { %v544_v30 = vmul.f32 %v1990_v22, %v1931_v3  ;;  %v2079_v8 = vpop.eup %1424  ;;  %v472_v11 = vadd.f32 %v1957_v56, %v471_v4  ;;  %vm474_vm11 = vweird.f32 %v1957_v56  ;;  %v507_v40 = vand.u32 2147483647, %v1905_v1 }
  0xf7   :  { %v515_v14 = vsub.f32 1.0, %v514_v61  ;;  %v2084_v52 = vpop.eup %1426  ;;  %vm2094_vm14 = vcmp.eq.f32.partialorder %v537_v35, 8.507059e+37  ;;  %v540_v26 = vor.u32 1.1754944e-38, %v539_v59  ;;  %vm503_vm15 = vweird.f32 %v1905_v1  ;;  %vm2108_vm12 = vmor %vm473_vm13, %vm474_vm11 }
  0xf8   :  { %vm504_vm8 = vweird.f32 %v1962_v27  ;;  %v536_v32 = vsel %vm2090_vm10, %v1948_v7, %v532_v39  ;;  %v502_v4 = vadd.f32 %v1962_v27, %v501_v34  ;;  %v509_v36 = vand.u32 2147483648, %v1905_v1 }
  0xf9   :  { %v576_v61 = vmul.f32 %v1973_v12, %v575_v49  ;;  %vm2112_vm9 = vcmp.eq.f32.partialorder %v477_v18, 8.507059e+37  ;;  %v480_v59 = vor.u32 1.1754944e-38, %v479_v51  ;;  %v545_v31 = vsub.f32 1.0, %v544_v30  ;;  %vm2135_vm11 = vmor %vm503_vm15, %vm504_vm8 }
  0xfa   :  { %v619_v7 = vmul.f32 %v1996_v42, %v1940_v46  ;;  %v476_v39 = vsel %vm2108_vm12, %v1957_v56, %v472_v11  ;;  %vm2121_vm10 = vcmp.eq.f32.partialorder %v507_v40, 8.507059e+37  ;;  %vm578_vm13 = vweird.f32 %v1918_v48 }
  0xfb   :  { %v516_v45 = vmul.f32 %v1983_v53, %v515_v14  ;;  %v2129_v49 = vsel %vm2094_vm14, %v540_v26, %v536_v32  ;;  %vm579_vm12 = vweird.f32 %v1973_v12  ;;  %v582_v56 = vand.u32 2147483647, %v1918_v48 }
  0xfc   :  { %v584_v51 = vand.u32 2147483648, %v1918_v48  ;;  %v506_v30 = vsel %vm2135_vm11, %v1962_v27, %v502_v4  ;;  %v510_v11 = vor.u32 1.1754944e-38, %v509_v36  ;;  %v577_v40 = vadd.f32 %v1973_v12, %v576_v61  ;;  %vm2166_vm14 = vmor %vm578_vm13, %vm579_vm12 }
  0xfd   :  { %v522_v14 = vand.u32 2147483647, %v1925_v37  ;;  %v2149_v1 = vsel %vm2112_vm9, %v480_v59, %v476_v39  ;;  %v524_v43 = vand.u32 2147483648, %v1925_v37  ;;  %v546_v60 = vmul.f32 %v1990_v22, %v545_v31 }
  0xfe   :  { %v620_v26 = vsub.f32 1.0, %v619_v7  ;;  %v517_v32 = vadd.f32 %v1983_v53, %v516_v45  ;;  %vm518_vm8 = vweird.f32 %v1925_v37  ;;  %vm519_vm15 = vweird.f32 %v1983_v53 }
  0xff   :  { %v559_v27 = vmul.f32 %v2006_v24, %v1946_v16  ;;  %v2160_v4 = vsel %vm2121_vm10, %v510_v11, %v506_v30  ;;  %vm2170_vm9 = vcmp.eq.f32.partialorder %v582_v56, 8.507059e+37  ;;  %v585_v37 = vor.u32 1.1754944e-38, %v584_v51  ;;  %vm2185_vm11 = vmor %vm518_vm8, %vm519_vm15 }
 0x100   :  { %v589_v61 = vmul.f32 %v2025_v15, %v1954_v62  ;;  %v581_v50 = vsel %vm2166_vm14, %v1973_v12, %v577_v40  ;;  %vm2179_vm10 = vcmp.eq.f32.partialorder %v522_v14, 8.507059e+37  ;;  %vm548_vm13 = vweird.f32 %v1931_v3 }
 0x101   :  { %v552_v48 = vand.u32 2147483647, %v1931_v3  ;;  %v525_v7 = vor.u32 1.1754944e-38, %v524_v43  ;;  %v547_v39 = vadd.f32 %v1990_v22, %v546_v60  ;;  %vm549_vm12 = vweird.f32 %v1990_v22 }
 0x102   :  { %v621_v34 = vmul.f32 %v1996_v42, %v620_v26  ;;  %v521_v12 = vsel %vm2185_vm11, %v1983_v53, %v517_v32  ;;  %v554_v45 = vand.u32 2147483648, %v1931_v3  ;;  %v627_v18 = vand.u32 2147483647, %v1940_v46  ;;  %vm2206_vm15 = vmor %vm548_vm13, %vm549_vm12 }
 0x103   :  { %v560_v56 = vsub.f32 1.0, %v559_v27  ;;  %v2199_v30 = vsel %vm2170_vm9, %v585_v37, %v581_v50  ;;  %vm623_vm8 = vweird.f32 %v1940_v46  ;;  %v629_v11 = vand.u32 2147483648, %v1940_v46 }
 0x104   :  { %v590_v40 = vsub.f32 1.0, %v589_v61  ;;  %vm2210_vm14 = vcmp.eq.f32.partialorder %v552_v48, 8.507059e+37  ;;  %vm624_vm9 = vweird.f32 %v1996_v42  ;;  %v664_v60 = vmul.f32 %v2043_v54, %v1969_v19 }
 0x105   :  { %v2219_v26 = vsel %vm2179_vm10, %v525_v7, %v521_v12  ;;  %v551_v3 = vsel %vm2206_vm15, %v1990_v22, %v547_v39  ;;  %v567_v32 = vand.u32 2147483647, %v1946_v16  ;;  %v555_v31 = vor.u32 1.1754944e-38, %v554_v45  ;;  %vm2242_vm12 = vmor %vm623_vm8, %vm624_vm9 }
 0x106   :  { %vm2226_vm13 = vcmp.eq.f32.partialorder %v627_v18, 8.507059e+37  ;;  %v561_v37 = vmul.f32 %v2006_v24, %v560_v56  ;;  %v630_v61 = vor.u32 1.1754944e-38, %v629_v11  ;;  %vm563_vm10 = vweird.f32 %v1946_v16 }
 0x107   :  { %vm564_vm11 = vweird.f32 %v2006_v24  ;;  %v591_v50 = vmul.f32 %v2025_v15, %v590_v40  ;;  %v2236_v35 = vsel %vm2210_vm14, %v555_v31, %v551_v3  ;;  %v569_v59 = vand.u32 2147483648, %v1946_v16 }
 0x108   :  { %v665_v7 = vsub.f32 1.0, %v664_v60  ;;  %vm2250_vm15 = vcmp.eq.f32.partialorder %v567_v32, 8.507059e+37  ;;  %v597_v45 = vand.u32 2147483647, %v1954_v62  ;;  %v562_v56 = vadd.f32 %v2006_v24, %v561_v37 }
 0x109   :  { %v592_v11 = vadd.f32 %v2025_v15, %v591_v50  ;;  %vm593_vm8 = vweird.f32 %v1954_v62  ;;  %vm594_vm14 = vweird.f32 %v2025_v15  ;;  %v570_v43 = vor.u32 1.1754944e-38, %v569_v59 }
 0x10a   :  { %v666_v60 = vmul.f32 %v2043_v54, %v665_v7  ;;  %vm2275_vm7 = vcmp.eq.f32.partialorder %v597_v45, 8.507059e+37  ;;  %vm668_vm6 = vweird.f32 %v1969_v19  ;;  %v674_v16 = vand.u32 2147483648, %v1969_v19 }
 0x10b   :  { %v612_v48 = vand.u32 2147483647, %v1978_v38  ;;  %v634_v59 = vmul.f32 %v2071_v55, %v2002_v29  ;;  %v659_v12 = vand.u32 2147483648, %v2011_v57 }
 0x11c   :  { %v394_v51 = vpop.xlane.xlu0 %393 }
 0x11d   :  { %v497_v14 = vmul.f32 %v2048_v13, %v394_v51  ;;  %v622_v13 = vadd.f32 %v1996_v42, %v621_v34  ;;  %v604_v51 = vmul.f32 %v2056_v58, %v1978_v38 }
 0x11f   :  { %v1280_v27 = vcvt.f32.s32 %v497_v14  ;;  %v1278_v39 = vand.u32 2147483647, %v497_v14  ;;  %v626_v34 = vsel %vm2242_vm12, %v1996_v42, %v622_v13  ;;  %v1283_v46 = vand.u32 2147483648, %v497_v14  ;;  %vm2271_vm12 = vmor %vm563_vm10, %vm564_vm11 }
 0x120   :  { %v599_v42 = vand.u32 2147483648, %v1954_v62  ;;  %v2264_v53 = vsel %vm2226_vm13, %v630_v61, %v626_v34  ;;  %v672_v62 = vand.u32 2147483647, %v1969_v19  ;;  %vm2284_vm13 = vmor %vm593_vm8, %vm594_vm14  ;;  %v605_v36 = vsub.f32 1.0, %v604_v51 }
 0x121   :  { %v1281_v22 = vcvt.s32.f32 %v1280_v27  ;;  %vm1279_vm9 = vcmp.lt.f32.partialorder %v1278_v39, 8388608.0  ;;  %v566_v27 = vsel %vm2271_vm12, %v2006_v24, %v562_v56  ;;  %v596_v50 = vsel %vm2284_vm13, %v2025_v15, %v592_v11 }
 0x122   :  { %vm669_vm10 = vweird.f32 %v2043_v54  ;;  %v667_v24 = vadd.f32 %v2043_v54, %v666_v60  ;;  %v2300_v39 = vsel %vm2250_vm15, %v570_v43, %v566_v27  ;;  %vm2302_vm11 = vcmp.eq.f32.partialorder %v672_v62, 8.507059e+37 }
 0x123   :  { %v1282_v18 = vand.u32 2147483647, %v1281_v22  ;;  %v600_v22 = vor.u32 1.1754944e-38, %v599_v42  ;;  %vm608_vm8 = vweird.f32 %v1978_v38  ;;  %v606_v45 = vmul.f32 %v2056_v58, %v605_v36  ;;  %vm2317_vm15 = vmor %vm668_vm6, %vm669_vm10 }
 0x124   :  { %vm609_vm14 = vweird.f32 %v2056_v58  ;;  %v614_v51 = vand.u32 2147483648, %v1978_v38  ;;  %v671_v42 = vsel %vm2317_vm15, %v2043_v54, %v667_v24  ;;  %v635_v43 = vsub.f32 1.0, %v634_v59 }
 0x125   :  { %v1284_v40 = vor.u32 %v1283_v46, %v1282_v18  ;;  %v2311_v56 = vsel %vm2275_vm7, %v600_v22, %v596_v50  ;;  %v644_v19 = vand.u32 2147483648, %v2002_v29  ;;  %v607_v31 = vadd.f32 %v2056_v58, %v606_v45  ;;  %vm2344_vm12 = vmor %vm608_vm8, %vm609_vm14 }
 0x126   :  { %v636_v34 = vmul.f32 %v2071_v55, %v635_v43  ;;  %vm639_vm13 = vweird.f32 %v2071_v55 }
 0x127   :  { %v1285_v32 = vsel %vm1279_vm9, %v1284_v40, %v497_v14  ;;  %vm2325_vm9 = vcmp.eq.f32.partialorder %v612_v48, 8.507059e+37  ;;  %v615_v48 = vor.u32 1.1754944e-38, %v614_v51 }
 0x128   :  { %v727_v37 = vshra.s32 %v1285_v32, 23  ;;  %v390_v61 = vpop.xlane.xlu1 %389 }
 0x129   :  { %v467_v14 = vmul.f32 %v2073_v9, %v390_v61  ;;  %v675_v9 = vor.u32 1.1754944e-38, %v674_v16  ;;  %v642_v16 = vand.u32 2147483647, %v2002_v29  ;;  %v1498_v61 = vmov 0  }
 0x12a   :  { %v743_v7 = vand.u32 255, %v727_v37 }
 0x12b   :  { %v1264_v15 = vcvt.f32.s32 %v467_v14  ;;  %v1262_v13 = vand.u32 2147483647, %v467_v14  ;;  %v1267_v27 = vand.u32 2147483648, %v467_v14  ;;  %v2334_v54 = vsel %vm2302_vm11, %v675_v9, %v671_v42 }
 0x12c   :  { %v775_v18 = vshll.u32 %v743_v7, 23  ;;  %v1168_v46 = vadd.s32 4294967295, %v743_v7  ;;  %v1152_v36 = vadd.s32 4294967169, %v743_v7  ;;  %vm638_vm11 = vweird.f32 %v2002_v29 }
 0x12d   :  { %v1265_v11 = vcvt.s32.f32 %v1264_v15  ;;  %vm1263_vm7 = vcmp.lt.f32.partialorder %v1262_v13, 8388608.0  ;;  %v2349_v15 = vor.u32 1.1754944e-38, %v644_v19  ;;  %v689_v29 = vand.u32 2147483648, %v2030_v5 }
 0x12e   :  { %v807_v60 = vsub.f32 %v1285_v32, %v775_v18  ;;  %v839_v3 = vshll.u32 %v1168_v46, 23  ;;  %v649_v32 = vmul.f32 %v2079_v8, %v2011_v57  ;;  %v657_v18 = vand.u32 2147483647, %v2011_v57 }
 0x12f   :  { %v1266_v62 = vand.u32 2147483647, %v1265_v11 }
 0x130   :  { %vm871_vm6 = vcmp.ge.f32.partialorder %v807_v60, %v839_v3  ;;  %v400_v37 = vpop.xlane.xlu0 %399  ;;  %v650_v46 = vsub.f32 1.0, %v649_v32  ;;  %v637_v3 = vadd.f32 %v2071_v55, %v636_v34 }
 0x131   :  { %v887_v50 = vsel %vm871_vm6, 1, %v1498_v61  ;;  %v1268_v22 = vor.u32 %v1267_v27, %v1266_v62  ;;  %v542_v24 = vmul.f32 %v2129_v49, %v400_v37  ;;  %v611_v49 = vsel %vm2344_vm12, %v2056_v58, %v607_v31 }
 0x132   :  { %v903_v59 = vadd.s32 %v1152_v36, %v887_v50  ;;  %v2364_v60 = vsel %vm2325_vm9, %v615_v48, %v611_v49  ;;  %v2369_v32 = vmul.f32 %v2079_v8, %v650_v46  ;;  %vm2371_vm9 = vcmp.eq.f32.partialorder %v642_v16, 8.507059e+37 }
 0x133   :  { %v1269_v9 = vsel %vm1263_vm7, %v1268_v22, %v467_v14  ;;  %v1304_v45 = vcvt.f32.s32 %v542_v24  ;;  %v1302_v11 = vand.u32 2147483647, %v542_v24  ;;  %v2360_v14 = vmul.f32 %v2084_v52, %v2030_v5 }
 0x134   :  { %vm953_vm10 = vcmp.gt.s32.totalorder %v903_v59, 0  ;;  %v725_v38 = vshra.s32 %v1269_v9, 23  ;;  %v1307_v62 = vand.u32 2147483648, %v542_v24  ;;  %vm919_vm14 = vcmp.ge.s32.totalorder %v903_v59, 256 }
 0x135   :  { %v954_v51 = vsel %vm953_vm10, %v903_v59, 0  ;;  %v1305_v42 = vcvt.s32.f32 %v1304_v45  ;;  %vm1303_vm15 = vcmp.lt.f32.partialorder %v1302_v11, 8388608.0  ;;  %vm935_vm12 = vmor %vm919_vm14, %vm423_vm0  ;;  %v680_v25 = vsub.f32 1.0, %v2360_v14 }
 0x136   :  { %vm985_vm8 = vcmp.lt.s32.totalorder %v954_v51, 255  ;;  %v741_v58 = vand.u32 255, %v725_v38  ;;  %v392_v43 = vpop.xlane.xlu2 %391  ;;  %vm2386_vm10 = vmor %vm638_vm11, %vm639_vm13 }
 0x137   :  { %v986_v13 = vsel %vm985_vm8, %v954_v51, 255  ;;  %v1306_v19 = vand.u32 2147483647, %v1305_v42  ;;  %v482_v27 = vmul.f32 %v2149_v1, %v392_v43  ;;  %v2380_v43 = vor.u32 1.1754944e-38, %v659_v12 }
 0x138   :  { %v1015_v31 = vsub.s32 127, %v986_v13  ;;  %v773_v36 = vshll.u32 %v741_v58, 23  ;;  %v1166_v37 = vadd.s32 4294967295, %v741_v58  ;;  %v1150_v40 = vadd.s32 4294967169, %v741_v58 }
 0x139   :  { %v1308_v50 = vor.u32 %v1307_v62, %v1306_v19  ;;  %v1272_v22 = vcvt.f32.s32 %v482_v27  ;;  %v1270_v38 = vand.u32 2147483647, %v482_v27  ;;  %v1275_v16 = vand.u32 2147483648, %v482_v27 }
 0x13a   :  { %vm1033_vm6 = vcmp.gt.s32.totalorder %v1015_v31, 0  ;;  %v805_v48 = vsub.f32 %v1269_v9, %v773_v36  ;;  %v837_v7 = vshll.u32 %v1166_v37, 23  ;;  %v396_v34 = vpop.xlane.xlu1 %395  ;;  %v641_v12 = vsel %vm2386_vm10, %v2071_v55, %v637_v3 }
 0x13b   :  { %v1034_v1 = vsel %vm1033_vm6, %v1015_v31, 0  ;;  %v1309_v49 = vsel %vm1303_vm15, %v1308_v50, %v542_v24  ;;  %v1273_v51 = vcvt.s32.f32 %v1272_v22  ;;  %v512_v11 = vmul.f32 %v2160_v4, %v396_v34 }
 0x13c   :  { %v1063_v42 = vshll.u32 %v1034_v1, 23  ;;  %vm869_vm7 = vcmp.ge.f32.partialorder %v805_v48, %v837_v7  ;;  %v730_v46 = vshra.s32 %v1309_v49, 23  ;;  %v687_v31 = vand.u32 2147483647, %v2030_v5 }
 0x13d   :  { %v885_v9 = vsel %vm869_vm7, 1, %v1498_v61  ;;  %v1274_v58 = vand.u32 2147483647, %v1273_v51  ;;  %v1288_v59 = vcvt.f32.s32 %v512_v11  ;;  %vm1271_vm8 = vcmp.lt.f32.partialorder %v1270_v38, 8388608.0 }
 0x13e   :  { %v1095_v13 = vsel %vm935_vm12, 0.0, %v1063_v42  ;;  %v901_v19 = vadd.s32 %v1150_v40, %v885_v9  ;;  %v746_v24 = vand.u32 255, %v730_v46  ;;  %v1286_v40 = vand.u32 2147483647, %v512_v11  ;;  %v406_v48 = vpop.xlane.xlu0 %405 }
 0x13f   :  { %1111 = vst [vmem:[#allocation7 + $0x10] sm:$0xff] %v1095_v13  ;;  %v1276_v4 = vor.u32 %v1275_v16, %v1274_v58  ;;  %v1289_v1 = vcvt.s32.f32 %v1288_v59  ;;  %v587_v55 = vmul.f32 %v2199_v30, %v406_v48  ;;  %v2400_v3 = vsel %vm2371_vm9, %v2349_v15, %v641_v12 }
 0x140   :  { %vm949_vm0 = vcmp.gt.s32.totalorder %v901_v19, 0  ;;  %v778_v36 = vshll.u32 %v746_v24, 23  ;;  %v1171_v50 = vadd.s32 4294967295, %v746_v24  ;;  %v1291_v58 = vand.u32 2147483648, %v512_v11 }
 0x141   :  { %v950_v37 = vsel %vm949_vm0, %v901_v19, 0  ;;  %v1277_v22 = vsel %vm1271_vm8, %v1276_v4, %v482_v27  ;;  %v1290_v9 = vand.u32 2147483647, %v1289_v1  ;;  %vm917_vm11 = vcmp.ge.s32.totalorder %v901_v19, 256 }
 0x142   :  { %vm981_vm13 = vcmp.lt.s32.totalorder %v950_v37, 255  ;;  %v810_v7 = vsub.f32 %v1309_v49, %v778_v36  ;;  %v726_v34 = vshra.s32 %v1277_v22, 23  ;;  %v842_v42 = vshll.u32 %v1171_v50, 23  ;;  %vm933_vm9 = vmor %vm917_vm11, %vm421_vm1 }
 0x143   :  { %v982_v51 = vsel %vm981_vm13, %v950_v37, 255  ;;  %v1155_v27 = vadd.s32 4294967169, %v746_v24  ;;  %v1328_v16 = vcvt.f32.s32 %v587_v55  ;;  %vm1287_vm6 = vcmp.lt.f32.partialorder %v1286_v40, 8388608.0  ;;  %v398_v37 = vpop.xlane.xlu2 %397 }
 0x144   :  { %v1013_v38 = vsub.s32 127, %v982_v51  ;;  %v742_v46 = vand.u32 255, %v726_v34  ;;  %vm874_vm14 = vcmp.ge.f32.partialorder %v810_v7, %v842_v42  ;;  %v1292_v59 = vor.u32 %v1291_v58, %v1290_v9 }
 0x145   :  { %v890_v49 = vsel %vm874_vm14, 1, %v1498_v61  ;;  %v1326_v12 = vand.u32 2147483647, %v587_v55  ;;  %v1329_v36 = vcvt.s32.f32 %v1328_v16  ;;  %v1331_v48 = vand.u32 2147483648, %v587_v55 }
 0x146   :  { %vm1029_vm15 = vcmp.gt.s32.totalorder %v1013_v38, 0  ;;  %v774_v13 = vshll.u32 %v742_v46, 23  ;;  %v906_v30 = vadd.s32 %v1155_v27, %v890_v49  ;;  %v1167_v4 = vadd.s32 4294967295, %v742_v46 }
 0x147   :  { %v1030_v62 = vsel %vm1029_vm15, %v1013_v38, 0  ;;  %v1293_v50 = vsel %vm1287_vm6, %v1292_v59, %v512_v11  ;;  %v1330_v1 = vand.u32 2147483647, %v1329_v36  ;;  %v1151_v51 = vadd.s32 4294967169, %v742_v46  ;;  %v402_v36 = vpop.xlane.xlu1 %401 }
 0x148   :  { %v1061_v45 = vshll.u32 %v1030_v62, 23  ;;  %v806_v15 = vsub.f32 %v1277_v22, %v774_v13  ;;  %vm959_vm7 = vcmp.gt.s32.totalorder %v906_v30, 0  ;;  %v838_v24 = vshll.u32 %v1167_v4, 23 }
 0x149   :  { %v960_v34 = vsel %vm959_vm7, %v906_v30, 0  ;;  %v728_v40 = vshra.s32 %v1293_v50, 23  ;;  %v2407_v22 = vmul.f32 %v2219_v26, %v398_v37  ;;  %v1332_v38 = vor.u32 %v1331_v48, %v1330_v1 }
 0x14a   :  { %v1093_v7 = vsel %vm933_vm9, 0.0, %v1061_v45  ;;  %vm991_vm12 = vcmp.lt.s32.totalorder %v960_v34, 255  ;;  %vm870_vm10 = vcmp.ge.f32.partialorder %v806_v15, %v838_v24  ;;  %vm1327_vm1 = vcmp.lt.f32.partialorder %v1326_v12, 8388608.0 }
 0x14b   :  { %1109 = vst [vmem:[#allocation7] sm:$0xff] %v1093_v7  ;;  %v992_v42 = vsel %vm991_vm12, %v960_v34, 255  ;;  %v886_v23 = vsel %vm870_vm10, 1, %v1498_v61  ;;  %v744_v19 = vand.u32 255, %v728_v40  ;;  %v2412_v11 = vadd.f32 %v2079_v8, %v2369_v32 }
 0x14c   :  { %v1018_v9 = vsub.s32 127, %v992_v42  ;;  %v902_v58 = vadd.s32 %v1151_v51, %v886_v23  ;;  %v1333_v49 = vsel %vm1327_vm1, %v1332_v38, %v587_v55  ;;  %v1296_v46 = vcvt.f32.s32 %v2407_v22 }
 0x14d   :  { %v776_v27 = vshll.u32 %v744_v19, 23  ;;  %v1169_v16 = vadd.s32 4294967295, %v744_v19  ;;  %vm654_vm0 = vweird.f32 %v2079_v8  ;;  %vm922_vm8 = vcmp.ge.s32.totalorder %v906_v30, 256 }
 0x14e   :  { %vm1039_vm13 = vcmp.gt.s32.totalorder %v1018_v9, 0  ;;  %vm951_vm11 = vcmp.gt.s32.totalorder %v902_v58, 0  ;;  %v733_v26 = vshra.s32 %v1333_v49, 23  ;;  %vm653_vm14 = vweird.f32 %v2011_v57  ;;  %vm938_vm6 = vmor %vm922_vm8, %vm426_vm2 }
 0x14f   :  { %v1040_v13 = vsel %vm1039_vm13, %v1018_v9, 0  ;;  %v952_v62 = vsel %vm951_vm11, %v902_v58, 0  ;;  %v808_v4 = vsub.f32 %v1293_v50, %v776_v27  ;;  %v840_v59 = vshll.u32 %v1169_v16, 23 }
 0x150   :  { %v1066_v45 = vshll.u32 %v1040_v13, 23  ;;  %vm983_vm15 = vcmp.lt.s32.totalorder %v952_v62, 255  ;;  %v749_v32 = vand.u32 255, %v733_v26  ;;  %v681_v55 = vmul.f32 %v2084_v52, %v680_v25 }
 0x151   :  { %v984_v30 = vsel %vm983_vm15, %v952_v62, 255  ;;  %v1153_v15 = vadd.s32 4294967169, %v744_v19  ;;  %vm872_vm9 = vcmp.ge.f32.partialorder %v808_v4, %v840_v59  ;;  %v1297_v12 = vcvt.s32.f32 %v1296_v46  ;;  %v412_v46 = vpop.xlane.xlu0 %411  ;;  %vm2443_vm15 = vmor %vm653_vm14, %vm654_vm0 }
 0x152   :  { %v1098_v37 = vsel %vm938_vm6, 0.0, %v1066_v45  ;;  %v1014_v24 = vsub.s32 127, %v984_v30  ;;  %v888_v50 = vsel %vm872_vm9, 1, %v1498_v61  ;;  %v1294_v48 = vand.u32 2147483647, %v2407_v22 }
 0x153   :  { %1114 = vst [vmem:[#allocation7 + $0x28] sm:$0xff] %v1098_v37  ;;  %v904_v7 = vadd.s32 %v1153_v15, %v888_v50  ;;  %v781_v34 = vshll.u32 %v749_v32, 23  ;;  %v1174_v14 = vadd.s32 4294967295, %v749_v32  ;;  %v1298_v40 = vand.u32 2147483647, %v1297_v12 }
 0x154   :  { %vm918_vm7 = vcmp.ge.s32.totalorder %v902_v58, 256  ;;  %vm1031_vm12 = vcmp.gt.s32.totalorder %v1014_v24, 0  ;;  %v1299_v6 = vand.u32 2147483648, %v2407_v22  ;;  %v557_v25 = vmul.f32 %v2236_v35, %v402_v36 }
 0x155   :  { %vm2428_vm2 = vcmp.eq.f32.partialorder %v657_v18, 8.507059e+37  ;;  %v1032_v51 = vsel %vm1031_vm12, %v1014_v24, 0  ;;  %vm955_vm10 = vcmp.gt.s32.totalorder %v904_v7, 0  ;;  %v813_v42 = vsub.f32 %v1333_v49, %v781_v34  ;;  %vm934_vm1 = vmor %vm918_vm7, %vm422_vm3 }
 0x156   :  { %v2434_v23 = vor.u32 1.1754944e-38, %v689_v29  ;;  %v1062_v19 = vshll.u32 %v1032_v51, 23  ;;  %v956_v38 = vsel %vm955_vm10, %v904_v7, 0  ;;  %v845_v9 = vshll.u32 %v1174_v14, 23 }
 0x157   :  { %v1300_v58 = vor.u32 %v1299_v6, %v1298_v40  ;;  %vm987_vm8 = vcmp.lt.s32.totalorder %v956_v38, 255  ;;  %v1158_v35 = vadd.s32 4294967169, %v749_v32  ;;  %vm1295_vm13 = vcmp.lt.f32.partialorder %v1294_v48, 8388608.0 }
 0x158   :  { %v1312_v18 = vcvt.f32.s32 %v557_v25  ;;  %v1094_v27 = vsel %vm934_vm1, 0.0, %v1062_v19  ;;  %v988_v16 = vsel %vm987_vm8, %v956_v38, 255  ;;  %vm877_vm11 = vcmp.ge.f32.partialorder %v813_v42, %v845_v9  ;;  %v408_v42 = vpop.xlane.xlu1 %407 }
 0x159   :  { %v1301_v49 = vsel %vm1295_vm13, %v1300_v58, %v2407_v22  ;;  %1110 = vst [vmem:[#allocation7 + $0x8] sm:$0xff] %v1094_v27  ;;  %v1016_v0 = vsub.s32 127, %v988_v16  ;;  %v893_v26 = vsel %vm877_vm11, 1, %v1498_v61  ;;  %v656_v62 = vsel %vm2443_vm15, %v2079_v8, %v2412_v11 }
 0x15a   :  { %v729_v13 = vshra.s32 %v1301_v49, 23  ;;  %v909_v22 = vadd.s32 %v1158_v35, %v893_v26  ;;  %v1310_v4 = vand.u32 2147483647, %v557_v25  ;;  %v1313_v59 = vcvt.s32.f32 %v1312_v18 }
 0x15b   :  { %v2453_v45 = vadd.f32 %v2084_v52, %v681_v55  ;;  %vm920_vm3 = vcmp.ge.s32.totalorder %v904_v7, 256  ;;  %vm1035_vm0 = vcmp.gt.s32.totalorder %v1016_v0, 0  ;;  %v632_v32 = vmul.f32 %v2264_v53, %v412_v46  ;;  %v404_v53 = vpop.xlane.xlu2 %403 }
 0x15c   :  { %v745_v57 = vand.u32 255, %v729_v13  ;;  %v1036_v30 = vsel %vm1035_vm0, %v1016_v0, 0  ;;  %vm965_vm14 = vcmp.gt.s32.totalorder %v909_v22, 0  ;;  %v1314_v15 = vand.u32 2147483647, %v1313_v59  ;;  %vm936_vm6 = vmor %vm920_vm3, %vm424_vm4 }
 0x15d   :  { %v1315_v12 = vand.u32 2147483648, %v557_v25  ;;  %v1064_v36 = vshll.u32 %v1036_v30, 23  ;;  %v966_v37 = vsel %vm965_vm14, %v909_v22, 0  ;;  %v2459_v8 = vsel %vm2428_vm2, %v2380_v43, %v656_v62 }
 0x15e   :  { %v777_v24 = vshll.u32 %v745_v57, 23  ;;  %vm997_vm9 = vcmp.lt.s32.totalorder %v966_v37, 255  ;;  %v1170_v11 = vadd.s32 4294967295, %v745_v57  ;;  %vm1311_vm7 = vcmp.lt.f32.partialorder %v1310_v4, 8388608.0 }
 0x15f   :  { %v1316_v55 = vor.u32 %v1315_v12, %v1314_v15  ;;  %v1096_v50 = vsel %vm936_vm6, 0.0, %v1064_v36  ;;  %v998_v48 = vsel %vm997_vm9, %v966_v37, 255  ;;  %v1352_v34 = vcvt.f32.s32 %v632_v32 }
 0x160   :  { %v809_v7 = vsub.f32 %v1301_v49, %v777_v24  ;;  %1112 = vst [vmem:[#allocation7 + $0x18] sm:$0xff] %v1096_v50  ;;  %vm925_vm12 = vcmp.ge.s32.totalorder %v909_v22, 256  ;;  %v1021_v14 = vsub.s32 127, %v998_v48  ;;  %v841_v40 = vshll.u32 %v1170_v11, 23 }
 0x161   :  { %v1317_v6 = vsel %vm1311_vm7, %v1316_v55, %v557_v25  ;;  %v1154_v1 = vadd.s32 4294967169, %v745_v57  ;;  %v1353_v51 = vcvt.s32.f32 %v1352_v34  ;;  %v572_v44 = vmul.f32 %v2300_v39, %v404_v53  ;;  %vm941_vm10 = vmor %vm925_vm12, %vm429_vm5  ;;  %v418_v34 = vpop.xlane.xlu0 %417 }
 0x162   :  { %v731_v43 = vshra.s32 %v1317_v6, 23  ;;  %vm1045_vm4 = vcmp.gt.s32.totalorder %v1021_v14, 0  ;;  %vm873_vm2 = vcmp.ge.f32.partialorder %v809_v7, %v841_v40  ;;  %v1350_v19 = vand.u32 2147483647, %v632_v32 }
 0x163   :  { %v1355_v38 = vand.u32 2147483648, %v632_v32  ;;  %v1046_v9 = vsel %vm1045_vm4, %v1021_v14, 0  ;;  %v889_v58 = vsel %vm873_vm2, 1, %v1498_v61  ;;  %v1354_v18 = vand.u32 2147483647, %v1353_v51 }
 0x164   :  { %v747_v35 = vand.u32 255, %v731_v43  ;;  %v1069_v27 = vshll.u32 %v1046_v9, 23  ;;  %v905_v16 = vadd.s32 %v1154_v1, %v889_v58  ;;  %v1320_v49 = vcvt.f32.s32 %v572_v44 }
 0x165   :  { %v2466_v25 = vmul.f32 %v2311_v56, %v408_v42  ;;  %v1356_v29 = vor.u32 %v1355_v38, %v1354_v18  ;;  %v1318_v0 = vand.u32 2147483647, %v572_v44  ;;  %vm684_vm1 = vweird.f32 %v2084_v52 }
 0x166   :  { %v779_v39 = vshll.u32 %v747_v35, 23  ;;  %v1172_v46 = vadd.s32 4294967295, %v747_v35  ;;  %v1101_v26 = vsel %vm941_vm10, 0.0, %v1069_v27  ;;  %vm957_vm8 = vcmp.gt.s32.totalorder %v905_v16, 0  ;;  %v410_v27 = vpop.xlane.xlu2 %409 }
 0x167   :  { %v1156_v13 = vadd.s32 4294967169, %v747_v35  ;;  %vm1351_vm13 = vcmp.lt.f32.partialorder %v1350_v19, 8388608.0  ;;  %1117 = vst [vmem:[#allocation7 + $0x40] sm:$0xff] %v1101_v26  ;;  %v958_v62 = vsel %vm957_vm8, %v905_v16, 0  ;;  %vm683_vm11 = vweird.f32 %v2030_v5 }
 0x168   :  { %v811_v4 = vsub.f32 %v1317_v6, %v779_v39  ;;  %v843_v59 = vshll.u32 %v1172_v46, 23  ;;  %v1357_v56 = vsel %vm1351_vm13, %v1356_v29, %v632_v32  ;;  %vm921_vm15 = vcmp.ge.s32.totalorder %v905_v16, 256  ;;  %vm2493_vm2 = vmor %vm683_vm11, %vm684_vm1 }
 0x169   :  { %vm989_vm3 = vcmp.lt.s32.totalorder %v958_v62, 255  ;;  %v736_v41 = vshra.s32 %v1357_v56, 23  ;;  %v1321_v22 = vcvt.s32.f32 %v1320_v49  ;;  %vm2473_vm0 = vcmp.lt.f32.partialorder %v1318_v0, 8388608.0 }
 0x16a   :  { %v990_v57 = vsel %vm989_vm3, %v958_v62, 255  ;;  %vm875_vm5 = vcmp.ge.f32.partialorder %v811_v4, %v843_v59  ;;  %v1336_v15 = vcvt.f32.s32 %v2466_v25  ;;  %v1323_v11 = vand.u32 2147483648, %v572_v44 }
 0x16b   :  { %v1017_v12 = vsub.s32 127, %v990_v57  ;;  %v891_v36 = vsel %vm875_vm5, 1, %v1498_v61  ;;  %v752_v37 = vand.u32 255, %v736_v41  ;;  %v1322_v24 = vand.u32 2147483647, %v1321_v22 }
 0x16c   :  { %v907_v32 = vadd.s32 %v1156_v13, %v891_v36  ;;  %v1334_v55 = vand.u32 2147483647, %v2466_v25  ;;  %v1337_v53 = vcvt.s32.f32 %v1336_v15  ;;  %v1339_v7 = vand.u32 2147483648, %v2466_v25 }
 0x16d   :  { %vm1037_vm14 = vcmp.gt.s32.totalorder %v1017_v12, 0  ;;  %v784_v50 = vshll.u32 %v752_v37, 23  ;;  %v1177_v48 = vadd.s32 4294967295, %v752_v37  ;;  %v1161_v40 = vadd.s32 4294967169, %v752_v37  ;;  %v414_v37 = vpop.xlane.xlu1 %413 }
 0x16e   :  { %v1038_v14 = vsel %vm1037_vm14, %v1017_v12, 0  ;;  %vm961_vm6 = vcmp.gt.s32.totalorder %v907_v32, 0  ;;  %v1324_v6 = vor.u32 %v1323_v11, %v1322_v24  ;;  %vm2663_vm9 = vcmp.eq.f32.partialorder %v1808_v2, 0.0 }
 0x16f   :  { %v1065_v1 = vshll.u32 %v1038_v14, 23  ;;  %v962_v43 = vsel %vm961_vm6, %v907_v32, 0  ;;  %v816_v51 = vsub.f32 %v1357_v56, %v784_v50  ;;  %v848_v42 = vshll.u32 %v1177_v48, 23  ;;  %vm937_vm7 = vmor %vm921_vm15, %vm2663_vm9 }
 0x170   :  { %vm993_vm12 = vcmp.lt.s32.totalorder %v962_v43, 255  ;;  %v1325_v19 = vsel %vm2473_vm0, %v1324_v6, %v572_v44  ;;  %v1338_v38 = vand.u32 2147483647, %v1337_v53  ;;  %v2487_v9 = vmul.f32 %v2334_v54, %v418_v34 }
 0x171   :  { %v1097_v58 = vsel %vm937_vm7, 0.0, %v1065_v1  ;;  %v994_v35 = vsel %vm993_vm12, %v962_v43, 255  ;;  %vm880_vm4 = vcmp.ge.f32.partialorder %v816_v51, %v848_v42  ;;  %v732_v18 = vshra.s32 %v1325_v19, 23 }
 0x172   :  { %1113 = vst [vmem:[#allocation7 + $0x20] sm:$0xff] %v1097_v58  ;;  %v1019_v16 = vsub.s32 127, %v994_v35  ;;  %v896_v44 = vsel %vm880_vm4, 1, %v1498_v61  ;;  %v1340_v49 = vor.u32 %v1339_v7, %v1338_v38  ;;  %v686_v54 = vsel %vm2493_vm2, %v2084_v52, %v2453_v45 }
 0x173   :  { %v912_v39 = vadd.s32 %v1161_v40, %v896_v44  ;;  %v748_v46 = vand.u32 255, %v732_v18  ;;  %vm1335_vm10 = vcmp.lt.f32.partialorder %v1334_v55, 8388608.0  ;;  %v1376_v29 = vcvt.f32.s32 %v2487_v9 }
 0x174   :  { %vm923_vm8 = vcmp.ge.s32.totalorder %v907_v32, 256  ;;  %vm1041_vm1 = vcmp.gt.s32.totalorder %v1019_v16, 0  ;;  %v1341_v0 = vsel %vm1335_vm10, %v1340_v49, %v2466_v25  ;;  %v2505_v26 = vmul.f32 %v2364_v60, %v410_v27 }
 0x175   :  { %v1042_v13 = vsel %vm1041_vm1, %v1019_v16, 0  ;;  %vm971_vm13 = vcmp.gt.s32.totalorder %v912_v39, 0  ;;  %v1374_v62 = vand.u32 2147483647, %v2487_v9  ;;  %v1379_v4 = vand.u32 2147483648, %v2487_v9 }
 0x176   :  { %v1067_v59 = vshll.u32 %v1042_v13, 23  ;;  %v972_v56 = vsel %vm971_vm13, %v912_v39, 0  ;;  %v780_v41 = vshll.u32 %v748_v46, 23  ;;  %v1173_v22 = vadd.s32 4294967295, %v748_v46 }
 0x177   :  { %vm2666_vm11 = vcmp.eq.f32.partialorder %v1823_v17, 0.0  ;;  %vm1003_vm3 = vcmp.lt.s32.totalorder %v972_v56, 255  ;;  %v734_v57 = vshra.s32 %v1341_v0, 23  ;;  %v1377_v30 = vcvt.s32.f32 %v1376_v29 }
 0x178   :  { %vm939_vm15 = vmor %vm923_vm8, %vm2666_vm11  ;;  %v1342_v25 = vand.u32 2147483647, %v2505_v26  ;;  %v1004_v15 = vsel %vm1003_vm3, %v972_v56, 255  ;;  %v812_v12 = vsub.f32 %v1325_v19, %v780_v41  ;;  %v844_v36 = vshll.u32 %v1173_v22, 23  ;;  %v416_v41 = vpop.xlane.xlu2 %415 }
 0x179   :  { %v1099_v60 = vsel %vm939_vm15, 0.0, %v1067_v59  ;;  %v1024_v24 = vsub.s32 127, %v1004_v15  ;;  %v750_v32 = vand.u32 255, %v734_v57  ;;  %vm2512_vm5 = vcmp.lt.f32.partialorder %v1374_v62, 8388608.0 }
 0x17a   :  { %1115 = vst [vmem:[#allocation7 + $0x30] sm:$0xff] %v1099_v60  ;;  %v1378_v55 = vand.u32 2147483647, %v1377_v30  ;;  %vm928_vm0 = vcmp.ge.s32.totalorder %v912_v39, 256  ;;  %v1157_v17 = vadd.s32 4294967169, %v748_v46  ;;  %vm876_vm14 = vcmp.ge.f32.partialorder %v812_v12, %v844_v36 }
 0x17b   :  { %v1344_v53 = vcvt.f32.s32 %v2505_v26  ;;  %vm1051_vm6 = vcmp.gt.s32.totalorder %v1024_v24, 0  ;;  %v892_v50 = vsel %vm876_vm14, 1, %v1498_v61  ;;  %v782_v48 = vshll.u32 %v750_v32, 23 }
 0x17c   :  { %v2519_v7 = vmul.f32 %v2400_v3, %v414_v37  ;;  %v1052_v34 = vsel %vm1051_vm6, %v1024_v24, 0  ;;  %v908_v14 = vadd.s32 %v1157_v17, %v892_v50  ;;  %v1175_v40 = vadd.s32 4294967295, %v750_v32 }
 0x17d   :  { %v1380_v6 = vor.u32 %v1379_v4, %v1378_v55  ;;  %v1072_v1 = vshll.u32 %v1052_v34, 23  ;;  %v814_v43 = vsub.f32 %v1341_v0, %v782_v48  ;;  %vm2521_vm9 = vcmp.lt.f32.partialorder %v1342_v25, 8388608.0  ;;  %v420_v55 = vpop.xlane.xlu1 %419 }
 0x17e   :  { %v1345_v42 = vcvt.s32.f32 %v1344_v53  ;;  %vm2671_vm7 = vcmp.eq.f32.partialorder %v1836_v10, 0.0  ;;  %vm963_vm4 = vcmp.gt.s32.totalorder %v908_v14, 0  ;;  %v846_v19 = vshll.u32 %v1175_v40, 23 }
 0x17f   :  { %vm944_vm12 = vmor %vm928_vm0, %vm2671_vm7  ;;  %v1381_v3 = vsel %vm2512_vm5, %v1380_v6, %v2487_v9  ;;  %v1347_v38 = vand.u32 2147483648, %v2505_v26  ;;  %v964_v35 = vsel %vm963_vm4, %v908_v14, 0  ;;  %vm2534_vm10 = vcmp.eq.f32.partialorder %v687_v31, 8.507059e+37 }
 0x180   :  { %v1104_v58 = vsel %vm944_vm12, 0.0, %v1072_v1  ;;  %v739_v18 = vshra.s32 %v1381_v3, 23  ;;  %v1346_v27 = vand.u32 2147483647, %v1345_v42  ;;  %vm995_vm8 = vcmp.lt.s32.totalorder %v964_v35, 255 }
 0x181   :  { %1120 = vst [vmem:[#allocation7 + $0x58] sm:$0xff] %v1104_v58  ;;  %v1159_v10 = vadd.s32 4294967169, %v750_v32  ;;  %vm878_vm1 = vcmp.ge.f32.partialorder %v814_v43, %v846_v19  ;;  %v1360_v44 = vcvt.f32.s32 %v2519_v7  ;;  %v996_v49 = vsel %vm995_vm8, %v964_v35, 255 }
 0x182   :  { %v894_v9 = vsel %vm878_vm1, 1, %v1498_v61  ;;  %v755_v39 = vand.u32 255, %v739_v18  ;;  %v1348_v46 = vor.u32 %v1347_v38, %v1346_v27  ;;  %v1020_v29 = vsub.s32 127, %v996_v49 }
 0x183   :  { %v910_v0 = vadd.s32 %v1159_v10, %v894_v9  ;;  %v1358_v13 = vand.u32 2147483647, %v2519_v7  ;;  %v1361_v5 = vcvt.s32.f32 %v1360_v44  ;;  %vm924_vm13 = vcmp.ge.s32.totalorder %v908_v14, 256 }
 0x184   :  { %v787_v31 = vshll.u32 %v755_v39, 23  ;;  %v1180_v62 = vadd.s32 4294967295, %v755_v39  ;;  %v1349_v4 = vsel %vm2521_vm9, %v1348_v46, %v2505_v26  ;;  %vm1043_vm11 = vcmp.gt.s32.totalorder %v1020_v29, 0 }
 0x185   :  { %vm967_vm15 = vcmp.gt.s32.totalorder %v910_v0, 0  ;;  %v735_v59 = vshra.s32 %v1349_v4, 23  ;;  %v1363_v56 = vand.u32 2147483648, %v2519_v7  ;;  %v1044_v22 = vsel %vm1043_vm11, %v1020_v29, 0 }
 0x186   :  { %v968_v57 = vsel %vm967_vm15, %v910_v0, 0  ;;  %v819_v30 = vsub.f32 %v1381_v3, %v787_v31  ;;  %v851_v25 = vshll.u32 %v1180_v62, 23  ;;  %v1068_v60 = vshll.u32 %v1044_v22, 23 }
 0x187   :  { %vm999_vm3 = vcmp.lt.s32.totalorder %v968_v57, 255  ;;  %v751_v15 = vand.u32 255, %v735_v59  ;;  %v1362_v12 = vand.u32 2147483647, %v1361_v5  ;;  %vm2674_vm5 = vcmp.eq.f32.partialorder %v1846_v47, 0.0 }
 0x188   :  { %vm940_vm0 = vmor %vm924_vm13, %vm2674_vm5  ;;  %v1000_v36 = vsel %vm999_vm3, %v968_v57, 255  ;;  %v1164_v26 = vadd.s32 4294967169, %v755_v39  ;;  %vm883_vm14 = vcmp.ge.f32.partialorder %v819_v30, %v851_v25  ;;  %v662_v37 = vmul.f32 %v2459_v8, %v416_v41 }
 0x189   :  { %v1100_v24 = vsel %vm940_vm0, 0.0, %v1068_v60  ;;  %v1022_v32 = vsub.s32 127, %v1000_v36  ;;  %v899_v11 = vsel %vm883_vm14, 1, %v1498_v61  ;;  %v691_v47 = vsel %vm2534_vm10, %v2434_v23, %v686_v54 }
 0x18a   :  { %1116 = vst [vmem:[#allocation7 + $0x38] sm:$0xff] %v1100_v24  ;;  %v915_v17 = vadd.s32 %v1164_v26, %v899_v11  ;;  %v783_v53 = vshll.u32 %v751_v15, 23  ;;  %v1176_v50 = vadd.s32 4294967295, %v751_v15  ;;  %v1364_v48 = vor.u32 %v1363_v56, %v1362_v12 }
 0x18b   :  { %vm926_vm6 = vcmp.ge.s32.totalorder %v910_v0, 256  ;;  %vm1047_vm9 = vcmp.gt.s32.totalorder %v1022_v32, 0  ;;  %vm1359_vm7 = vcmp.lt.f32.partialorder %v1358_v13, 8388608.0  ;;  %v1368_v8 = vcvt.f32.s32 %v662_v37 }
 0x18c   :  { %v1048_v34 = vsel %vm1047_vm9, %v1022_v32, 0  ;;  %vm977_vm12 = vcmp.gt.s32.totalorder %v915_v17, 0  ;;  %v815_v2 = vsub.f32 %v1349_v4, %v783_v53  ;;  %v2558_v14 = vmul.f32 %v691_v47, %v420_v55 }
 0x18d   :  { %v1070_v52 = vshll.u32 %v1048_v34, 23  ;;  %v978_v45 = vsel %vm977_vm12, %v915_v17, 0  ;;  %v847_v40 = vshll.u32 %v1176_v50, 23  ;;  %v1365_v23 = vsel %vm1359_vm7, %v1364_v48, %v2519_v7 }
 0x18e   :  { %vm2675_vm2 = vcmp.eq.f32.partialorder %v1850_v28, 0.0  ;;  %vm1009_vm10 = vcmp.lt.s32.totalorder %v978_v45, 255  ;;  %v737_v54 = vshra.s32 %v1365_v23, 23  ;;  %v1366_v6 = vand.u32 2147483647, %v662_v37 }
 0x18f   :  { %vm942_vm4 = vmor %vm926_vm6, %vm2675_vm2  ;;  %v1369_v1 = vcvt.s32.f32 %v1368_v8  ;;  %v1010_v51 = vsel %vm1009_vm10, %v978_v45, 255  ;;  %v1160_v42 = vadd.s32 4294967169, %v751_v15  ;;  %vm879_vm8 = vcmp.ge.f32.partialorder %v815_v2, %v847_v40 }
 0x190   :  { %v1102_v43 = vsel %vm942_vm4, 0.0, %v1070_v52  ;;  %v1027_v19 = vsub.s32 127, %v1010_v51  ;;  %v895_v3 = vsel %vm879_vm8, 1, %v1498_v61  ;;  %v753_v38 = vand.u32 255, %v737_v54 }
 0x191   :  { %1118 = vst [vmem:[#allocation7 + $0x48] sm:$0xff] %v1102_v43  ;;  %v1370_v58 = vand.u32 2147483647, %v1369_v1  ;;  %vm931_vm1 = vcmp.ge.s32.totalorder %v915_v17, 256  ;;  %v911_v35 = vadd.s32 %v1160_v42, %v895_v3  ;;  %v1371_v7 = vand.u32 2147483648, %v662_v37 }
 0x192   :  { %v1384_v28 = vcvt.f32.s32 %v2558_v14  ;;  %vm1057_vm13 = vcmp.gt.s32.totalorder %v1027_v19, 0  ;;  %v785_v18 = vshll.u32 %v753_v38, 23  ;;  %v1178_v27 = vadd.s32 4294967295, %v753_v38 }
 0x193   :  { %vm1367_vm11 = vcmp.lt.f32.partialorder %v1366_v6, 8388608.0  ;;  %v1058_v16 = vsel %vm1057_vm13, %v1027_v19, 0  ;;  %vm969_vm15 = vcmp.gt.s32.totalorder %v911_v35, 0  ;;  %v1372_v10 = vor.u32 %v1371_v7, %v1370_v58  ;;  %v2680_v58 = vld [vmem:[#allocation11_spill] sm:$0xff] }
 0x194   :  { %v1382_v44 = vand.u32 2147483647, %v2558_v14  ;;  %v1075_v49 = vshll.u32 %v1058_v16, 23  ;;  %v970_v9 = vsel %vm969_vm15, %v911_v35, 0  ;;  %v817_v39 = vsub.f32 %v1365_v23, %v785_v18 }
 0x195   :  { %v849_v46 = vshll.u32 %v1178_v27, 23  ;;  %vm2676_vm3 = vcmp.eq.f32.partialorder %v1854_v20, 0.0  ;;  %vm1001_vm0 = vcmp.lt.s32.totalorder %v970_v9, 255  ;;  %v1162_v29 = vadd.s32 4294967169, %v753_v38 }
 0x196   :  { %vm947_vm5 = vmor %vm931_vm1, %vm2676_vm3  ;;  %v1373_v0 = vsel %vm1367_vm11, %v1372_v10, %v662_v37  ;;  %v1385_v13 = vcvt.s32.f32 %v1384_v28  ;;  %v1002_v31 = vsel %vm1001_vm0, %v970_v9, 255  ;;  %v1387_v41 = vand.u32 2147483648, %v2558_v14 }
 0x197   :  { %v1107_v5 = vsel %vm947_vm5, 0.0, %v1075_v49  ;;  %vm881_vm14 = vcmp.ge.f32.partialorder %v817_v39, %v849_v46  ;;  %v738_v62 = vshra.s32 %v1373_v0, 23  ;;  %v1023_v4 = vsub.s32 127, %v1002_v31 }
 0x198   :  { %1123 = vst [vmem:[#allocation7 + $0x70] sm:$0xff] %v1107_v5  ;;  %v897_v59 = vsel %vm881_vm14, 1, %v1498_v61  ;;  %v1386_v56 = vand.u32 2147483647, %v1385_v13  ;;  %vm927_vm6 = vcmp.ge.s32.totalorder %v911_v35, 256  ;;  %vm1383_vm12 = vcmp.lt.f32.partialorder %v1382_v44, 8388608.0 }
 0x199   :  { %v913_v22 = vadd.s32 %v1162_v29, %v897_v59  ;;  %v754_v57 = vand.u32 255, %v738_v62  ;;  %vm1049_vm9 = vcmp.gt.s32.totalorder %v1023_v4, 0  ;;  %vm2677_vm2 = vcmp.eq.f32.partialorder %v1860_v21, 0.0 }
 0x19a   :  { %v1388_v20 = vor.u32 %v1387_v41, %v1386_v56  ;;  %v1050_v30 = vsel %vm1049_vm9, %v1023_v4, 0  ;;  %vm943_vm4 = vmor %vm927_vm6, %vm2677_vm2  ;;  %vm2678_vm11 = vcmp.eq.f32.partialorder %v1863_v33, 0.0 }
 0x19b   :  { %vm973_vm7 = vcmp.gt.s32.totalorder %v913_v22, 0  ;;  %v1071_v25 = vshll.u32 %v1050_v30, 23  ;;  %v786_v15 = vshll.u32 %v754_v57, 23  ;;  %v1179_v12 = vadd.s32 4294967295, %v754_v57 }
 0x19c   :  { %v974_v60 = vsel %vm973_vm7, %v913_v22, 0  ;;  %v1389_v36 = vsel %vm1383_vm12, %v1388_v20, %v2558_v14  ;;  %v1163_v55 = vadd.s32 4294967169, %v754_v57  ;;  %vm929_vm1 = vcmp.ge.s32.totalorder %v913_v22, 256 }
 0x19d   :  { %vm1005_vm10 = vcmp.lt.s32.totalorder %v974_v60, 255  ;;  %v1103_v26 = vsel %vm943_vm4, 0.0, %v1071_v25  ;;  %v818_v24 = vsub.f32 %v1373_v0, %v786_v15  ;;  %v850_v32 = vshll.u32 %v1179_v12, 23  ;;  %vm945_vm15 = vmor %vm929_vm1, %vm2678_vm11 }
 0x19e   :  { %v1006_v37 = vsel %vm1005_vm10, %v974_v60, 255  ;;  %1119 = vst [vmem:[#allocation7 + $0x50] sm:$0xff] %v1103_v26  ;;  %v740_v47 = vshra.s32 %v1389_v36, 23  ;;  %vm2679_vm7 = vcmp.eq.f32.partialorder %v1866_v63, 0.0 }
 0x19f   :  { %v1025_v11 = vsub.s32 127, %v1006_v37  ;;  %vm882_vm8 = vcmp.ge.f32.partialorder %v818_v24, %v850_v32 }
 0x1a0   :  { %v898_v17 = vsel %vm882_vm8, 1, %v1498_v61  ;;  %v756_v53 = vand.u32 255, %v740_v47  ;;  %vm2681_vm8 = vcmp.eq.f32.partialorder %v2680_v58, 0.0 }
 0x1a1   :  { %vm1053_vm13 = vcmp.gt.s32.totalorder %v1025_v11, 0  ;;  %v914_v21 = vadd.s32 %v1163_v55, %v898_v17 }
 0x1a2   :  { %v1054_v50 = vsel %vm1053_vm13, %v1025_v11, 0  ;;  %v788_v8 = vshll.u32 %v756_v53, 23  ;;  %v1181_v34 = vadd.s32 4294967295, %v756_v53  ;;  %v1165_v23 = vadd.s32 4294967169, %v756_v53 }
 0x1a3   :  { %v1073_v48 = vshll.u32 %v1054_v50, 23  ;;  %vm975_vm3 = vcmp.gt.s32.totalorder %v914_v21, 0  ;;  %vm930_vm14 = vcmp.ge.s32.totalorder %v914_v21, 256 }
 0x1a4   :  { %v976_v14 = vsel %vm975_vm3, %v914_v21, 0  ;;  %v820_v52 = vsub.f32 %v1389_v36, %v788_v8  ;;  %v852_v45 = vshll.u32 %v1181_v34, 23  ;;  %vm946_vm12 = vmor %vm930_vm14, %vm2679_vm7 }
 0x1a5   :  { %v1105_v2 = vsel %vm945_vm15, 0.0, %v1073_v48  ;;  %vm1007_vm5 = vcmp.lt.s32.totalorder %v976_v14, 255 }
 0x1a6   :  { %1121 = vst [vmem:[#allocation7 + $0x60] sm:$0xff] %v1105_v2  ;;  %v1008_v40 = vsel %vm1007_vm5, %v976_v14, 255  ;;  %vm884_vm0 = vcmp.ge.f32.partialorder %v820_v52, %v852_v45 }
 0x1a7   :  { %v1026_v54 = vsub.s32 127, %v1008_v40  ;;  %v900_v6 = vsel %vm884_vm0, 1, %v1498_v61 }
 0x1a8   :  { %v916_v1 = vadd.s32 %v1165_v23, %v900_v6 }
 0x1a9   :  { %vm1055_vm6 = vcmp.gt.s32.totalorder %v1026_v54, 0 }
 0x1aa   :  { %v1056_v43 = vsel %vm1055_vm6, %v1026_v54, 0  ;;  %vm979_vm9 = vcmp.gt.s32.totalorder %v916_v1, 0  ;;  %vm932_vm4 = vcmp.ge.s32.totalorder %v916_v1, 256 }
 0x1ab   :  { %v1074_v33 = vshll.u32 %v1056_v43, 23  ;;  %v980_v51 = vsel %vm979_vm9, %v916_v1, 0  ;;  %vm948_vm1 = vmor %vm932_vm4, %vm2681_vm8 }
 0x1ac   :  { %vm1011_vm2 = vcmp.lt.s32.totalorder %v980_v51, 255 }
 0x1ad   :  { %v1106_v42 = vsel %vm946_vm12, 0.0, %v1074_v33  ;;  %v1012_v19 = vsel %vm1011_vm2, %v980_v51, 255 }
 0x1ae   :  { %1122 = vst [vmem:[#allocation7 + $0x68] sm:$0xff] %v1106_v42  ;;  %v1028_v3 = vsub.s32 127, %v1012_v19 }
 0x1b0   :  { %vm1059_vm10 = vcmp.gt.s32.totalorder %v1028_v3, 0 }
 0x1b1   :  { %v1060_v61 = vsel %vm1059_vm10, %v1028_v3, 0 }
 0x1b2   :  { %v1076_v38 = vshll.u32 %v1060_v61, 23 }
 0x1b4   :  { %v1108_v63 = vsel %vm948_vm1, 0.0, %v1076_v38 }
 0x1b5   :  { %1124 = vst [vmem:[#allocation7 + $0x78] sm:$0xff] %v1108_v63 }
 0x1b6   :  { %1137 = dma.vmem_to_hbm [thread:$0]  %s1130_s25, 2048, %s1132_s28, [#allocation4], %s1496_s18, %s1496_s18, %s1497_s19  }
 0x1b7   :  { %1492 = dma.done.wait [#allocation4], 2048  }
 0x1b8   :  { %1493 = vsyncadd [#allocation4], 4294965248 }
 0x1b9   :  { %1142 = vsyncpa [#allocation3], 1 }
 0x1ba   :  { %1143 = vsyncpa [#allocation4], 1 }
 0x1bb   :  { %1144 = vsyncpa [#allocation5], 1 }

</bundles_post_ra>
